<compile_context>
chip_gen: v7x
topology: tpu7x:2x2x1
jax: 0.10.0
libtpu: 0.0.40
codegen_flags: <defaults>
</compile_context>

<pallas_src>
import functools
import math

import jax
import jax.numpy as jnp
from jax.experimental import pallas as pl
from jax.experimental.pallas import tpu as pltpu


def _round_up(x, m):
    return (x + m - 1) // m * m


def _vmem_capacity_bytes():
    try:
        cap = getattr(pltpu.get_tpu_info(), "vmem_capacity_bytes", None)
        if cap:
            return int(cap)
    except Exception:
        pass
    return 64 << 20  # conservative default (v7x per-core VMEM)


# --------------------------------- kernel ------------------------------------
def _encoder_image_global_kernel(w_r_ref, x_ref, w_fc_ref, bias_ref, out_ref,
                                 *, n_regions, no_imgnorm):
    # fc1 first: weighted sum over the 36 regions, f32 accumulation.
    # Stream one (BT, E) region slice at a time from the ref (no (BT, R, E)
    # product temporary); fc1 weights are scalars read from SMEM.
    acc = w_r_ref[0] * x_ref[:, 0, :].astype(jnp.float32)
    for r in range(1, n_regions):
        acc = acc + w_r_ref[r] * x_ref[:, r, :].astype(jnp.float32)

    # fc projection on the MXU (+ exactly-folded bias).  Padded G columns of
    # the weight/bias are zero, so they stay zero in `feat`.
    feat = jnp.dot(acc.astype(w_fc_ref.dtype), w_fc_ref[...],
                   preferred_element_type=jnp.float32) + bias_ref[...]

    if not no_imgnorm:
        # l2norm(dim=-1), reference eps placement: X / (sqrt(sum(X^2)) + 1e-8).
        ss = jnp.sum(feat * feat, axis=-1, keepdims=True)
        feat = feat * pl.reciprocal(jnp.sqrt(ss) + 1e-8, approx=True)

    out_ref[...] = feat.astype(out_ref.dtype)


# --------------------------- pallas_call builder ------------------------------
def _call(x, w_fcT, bias, w_r, *, BT, Gpad, no_imgnorm, vmem_limit,
          single_buffer_invariants):
    B, R, E = x.shape
    inv_kwargs = (dict(pipeline_mode=pl.Buffered(1))
                  if single_buffer_invariants else {})

    kernel = functools.partial(_encoder_image_global_kernel,
                               n_regions=R, no_imgnorm=no_imgnorm)

    return pl.pallas_call(
        kernel,
        out_shape=jax.ShapeDtypeStruct((B, Gpad), jnp.float32),
        grid_spec=pltpu.PrefetchScalarGridSpec(
            num_scalar_prefetch=0,
            grid=(pl.cdiv(B, BT),),
            in_specs=[
                # fc1 weights: tiny, scalar-indexed -> SMEM.
                pl.BlockSpec(memory_space=pltpu.MemorySpace.SMEM),
                # images: natural layout, full R/E extents (no pad copy).
                pl.BlockSpec((BT, R, E), lambda i: (i, 0, 0)),
                # grid-invariant projection weight / folded bias.
                pl.BlockSpec((E, Gpad), lambda i: (0, 0), **inv_kwargs),
                pl.BlockSpec((1, Gpad), lambda i: (0, 0), **inv_kwargs),
            ],
            out_specs=pl.BlockSpec((BT, Gpad), lambda i: (i, 0)),
        ),
        compiler_params=pltpu.CompilerParams(
            dimension_semantics=("parallel",),
            vmem_limit_bytes=int(vmem_limit),
        ),
    )(w_r, x, w_fcT, bias)


# --------------------------------- wrapper ------------------------------------
def encoder_image_global_forward(images, fc_w, fc_b, fc1_w, fc1_b, *,
                                 no_imgnorm=False, block_b=None):
    """images: (B, 36, E); fc_w: (G, E); fc_b: (G,); fc1_w: (1, 36);
    fc1_b: (1,).  Returns (B, G) float32."""
    B, R, E = images.shape
    G, E_w = fc_w.shape
    assert E_w == E and fc1_w.shape == (1, R)

    # Stream images in their incoming dtype (no layout copy, no forced cast:
    # a wrapper-side cast would add a full extra read+write of the dominant
    # tensor).  bf16 in -> bf16 MXU path; anything else runs in f32.
    if images.dtype == jnp.bfloat16:
        x, mxu_dtype = images, jnp.bfloat16
    else:
        x = images if images.dtype == jnp.float32 else images.astype(jnp.float32)
        mxu_dtype = jnp.float32

    Gpad = _round_up(G, 128)        # lane-dense output tile -> unmasked stores
    w_fcT = jnp.zeros((E, Gpad), mxu_dtype).at[:, :G].set(fc_w.T.astype(mxu_dtype))
    # Folded bias: fc1 applied to the per-region fc bias => sum(fc1_w)*fc_b + fc1_b.
    s = jnp.sum(fc1_w.astype(jnp.float32))
    bias = jnp.zeros((1, Gpad), jnp.float32).at[0, :G].set(
        s * fc_b.astype(jnp.float32) + fc1_b.astype(jnp.float32)[0])
    w_r = fc1_w.astype(jnp.float32).reshape(R)

    # ---- batch tile sized from the per-generation VMEM budget ---------------
    vmem_limit = (_vmem_capacity_bytes() * 3) // 4          # leave headroom
    item = jnp.dtype(x.dtype).itemsize
    w_item = jnp.dtype(mxu_dtype).itemsize
    fixed = 2 * E * Gpad * w_item + 4 * Gpad * 4 + (512 << 10)   # weights/bias/slack
    per_row = 2 * R * E * item + 2 * Gpad * 4 + 4 * E            # imgs dbuf + out dbuf + acc
    if block_b is None:
        block_b = max(8, min(512, int((vmem_limit - fixed) // per_row)))
        block_b = (block_b // 8) * 8
        if B > 16:
            # Keep >= 2 grid steps so ("parallel",) can shard across TCs (v7x).
            block_b = min(block_b, _round_up(-(-B // 2), 8))
    BT = B if B <= block_b else block_b          # partial last block is handled

    try:
        out = _call(x, w_fcT, bias, w_r, BT=BT, Gpad=Gpad,
                    no_imgnorm=no_imgnorm, vmem_limit=vmem_limit,
                    single_buffer_invariants=True)
    except Exception:
        # Fallback: identical kernel without Buffered(1) on invariant operands.
        out = _call(x, w_fcT, bias, w_r, BT=BT, Gpad=Gpad,
                    no_imgnorm=no_imgnorm, vmem_limit=vmem_limit,
                    single_buffer_invariants=False)
    return out[:, :G]


# ------------------------ pure-JAX reference (checking) -----------------------
def _reference(images, fc_w, fc_b, fc1_w, fc1_b, no_imgnorm=False):
    feats = jnp.einsum("bre,ge->brg", images, fc_w) + fc_b        # fc
    feats = jnp.einsum("brg,r->bg", feats, fc1_w[0]) + fc1_b[0]   # fc1 over regions
    if not no_imgnorm:
        norm = jnp.sqrt(jnp.sum(feats * feats, axis=-1, keepdims=True)) + 1e-8
        feats = feats / norm
    return feats


if __name__ == "__main__":
    B, R = 2, 36                       # 36 regions fixed by fc1 = nn.Linear(36, 1)
    embed_size, global_embed_size = 32, 16

    key = jax.random.PRNGKey(0)
    k1, k2, k3, k4, k5 = jax.random.split(key, 5)

    images_f32 = jax.random.normal(k1, (B, R, embed_size), jnp.float32)
    b_fc = 1.0 / math.sqrt(embed_size)
    fc_w = jax.random.uniform(k2, (global_embed_size, embed_size),
                              jnp.float32, -b_fc, b_fc)
    fc_b = jax.random.uniform(k3, (global_embed_size,), jnp.float32, -b_fc, b_fc)
    b_fc1 = 1.0 / math.sqrt(R)
    fc1_w = jax.random.uniform(k4, (1, R), jnp.float32, -b_fc1, b_fc1)
    fc1_b = jax.random.uniform(k5, (1,), jnp.float32, -b_fc1, b_fc1)

    # f32 streaming path.
    out_f32 = jax.block_until_ready(
        encoder_image_global_forward(images_f32, fc_w, fc_b, fc1_w, fc1_b))
    ref_f32 = _reference(images_f32, fc_w, fc_b, fc1_w, fc1_b)
    assert out_f32.shape == (B, global_embed_size)
    assert bool(jnp.all(jnp.isfinite(out_f32)))
    assert bool(jnp.allclose(out_f32, ref_f32, atol=1e-2, rtol=1e-2))

    # bf16 streaming path (halves HBM traffic on the dominant tensor).
    images_bf16 = images_f32.astype(jnp.bfloat16)
    out_bf16 = jax.block_until_ready(
        encoder_image_global_forward(images_bf16, fc_w, fc_b, fc1_w, fc1_b))
    ref_bf16 = _reference(images_bf16.astype(jnp.float32), fc_w, fc_b, fc1_w, fc1_b)
    assert out_bf16.shape == (B, global_embed_size)
    assert bool(jnp.all(jnp.isfinite(out_bf16)))
    assert bool(jnp.allclose(out_bf16, ref_bf16, atol=2.5e-2, rtol=2.5e-2))

    print("KERNEL_OK")
</pallas_src>

<mosaic_0001>
module attributes {stable_mosaic.version = 11 : i64} {
  func.func @_encoder_image_global_kernel(%arg0: i32, %arg1: memref<36xf32, #tpu.memory_space<smem>>, %arg2: memref<2x36x32xf32, #tpu.memory_space<vmem>>, %arg3: memref<32x128xf32, #tpu.memory_space<vmem>>, %arg4: memref<1x128xf32, #tpu.memory_space<vmem>>, %arg5: memref<2x128xf32, #tpu.memory_space<vmem>>) attributes {dimension_semantics = [#tpu.dimension_semantics<parallel>], iteration_bounds = array<i64: 1>, scalar_prefetch = 0 : i64, scratch_operands = 0 : i64, tpu.core_type = #tpu.core_type<tc>, window_params = [{transform_indices = @transform_0, window_bounds = array<i64: 36>}, {transform_indices = @transform_1, window_bounds = array<i64: 2, 36, 32>}, {pipeline_mode = #tpu.pipeline_mode<synchronous>, transform_indices = @transform_2, window_bounds = array<i64: 32, 128>}, {pipeline_mode = #tpu.pipeline_mode<synchronous>, transform_indices = @transform_3, window_bounds = array<i64: 1, 128>}, {transform_indices = @transform_4, window_bounds = array<i64: 2, 128>}]} {
    %c0 = arith.constant 0 : index
    %0 = memref.load %arg1[%c0] : memref<36xf32, #tpu.memory_space<smem>>
    %c0_0 = arith.constant 0 : index
    %c0_1 = arith.constant 0 : index
    %c0_2 = arith.constant 0 : index
    %1 = vector.load %arg2[%c0_0, %c0_1, %c0_2] : memref<2x36x32xf32, #tpu.memory_space<vmem>>, vector<2x1x32xf32>
    %2 = vector.shape_cast %1 : vector<2x1x32xf32> to vector<2x32xf32>
    %3 = vector.broadcast %0 : f32 to vector<2x32xf32>
    %4 = arith.mulf %3, %2 : vector<2x32xf32>
    %c1 = arith.constant 1 : index
    %5 = memref.load %arg1[%c1] : memref<36xf32, #tpu.memory_space<smem>>
    %c0_3 = arith.constant 0 : index
    %c1_4 = arith.constant 1 : index
    %c0_5 = arith.constant 0 : index
    %6 = vector.load %arg2[%c0_3, %c1_4, %c0_5] : memref<2x36x32xf32, #tpu.memory_space<vmem>>, vector<2x1x32xf32>
    %7 = vector.shape_cast %6 : vector<2x1x32xf32> to vector<2x32xf32>
    %8 = vector.broadcast %5 : f32 to vector<2x32xf32>
    %9 = arith.mulf %8, %7 : vector<2x32xf32>
    %10 = arith.addf %4, %9 : vector<2x32xf32>
    %c2 = arith.constant 2 : index
    %11 = memref.load %arg1[%c2] : memref<36xf32, #tpu.memory_space<smem>>
    %c0_6 = arith.constant 0 : index
    %c2_7 = arith.constant 2 : index
    %c0_8 = arith.constant 0 : index
    %12 = vector.load %arg2[%c0_6, %c2_7, %c0_8] : memref<2x36x32xf32, #tpu.memory_space<vmem>>, vector<2x1x32xf32>
    %13 = vector.shape_cast %12 : vector<2x1x32xf32> to vector<2x32xf32>
    %14 = vector.broadcast %11 : f32 to vector<2x32xf32>
    %15 = arith.mulf %14, %13 : vector<2x32xf32>
    %16 = arith.addf %10, %15 : vector<2x32xf32>
    %c3 = arith.constant 3 : index
    %17 = memref.load %arg1[%c3] : memref<36xf32, #tpu.memory_space<smem>>
    %c0_9 = arith.constant 0 : index
    %c3_10 = arith.constant 3 : index
    %c0_11 = arith.constant 0 : index
    %18 = vector.load %arg2[%c0_9, %c3_10, %c0_11] : memref<2x36x32xf32, #tpu.memory_space<vmem>>, vector<2x1x32xf32>
    %19 = vector.shape_cast %18 : vector<2x1x32xf32> to vector<2x32xf32>
    %20 = vector.broadcast %17 : f32 to vector<2x32xf32>
    %21 = arith.mulf %20, %19 : vector<2x32xf32>
    %22 = arith.addf %16, %21 : vector<2x32xf32>
    %c4 = arith.constant 4 : index
    %23 = memref.load %arg1[%c4] : memref<36xf32, #tpu.memory_space<smem>>
    %c0_12 = arith.constant 0 : index
    %c4_13 = arith.constant 4 : index
    %c0_14 = arith.constant 0 : index
    %24 = vector.load %arg2[%c0_12, %c4_13, %c0_14] : memref<2x36x32xf32, #tpu.memory_space<vmem>>, vector<2x1x32xf32>
    %25 = vector.shape_cast %24 : vector<2x1x32xf32> to vector<2x32xf32>
    %26 = vector.broadcast %23 : f32 to vector<2x32xf32>
    %27 = arith.mulf %26, %25 : vector<2x32xf32>
    %28 = arith.addf %22, %27 : vector<2x32xf32>
    %c5 = arith.constant 5 : index
    %29 = memref.load %arg1[%c5] : memref<36xf32, #tpu.memory_space<smem>>
    %c0_15 = arith.constant 0 : index
    %c5_16 = arith.constant 5 : index
    %c0_17 = arith.constant 0 : index
    %30 = vector.load %arg2[%c0_15, %c5_16, %c0_17] : memref<2x36x32xf32, #tpu.memory_space<vmem>>, vector<2x1x32xf32>
    %31 = vector.shape_cast %30 : vector<2x1x32xf32> to vector<2x32xf32>
    %32 = vector.broadcast %29 : f32 to vector<2x32xf32>
    %33 = arith.mulf %32, %31 : vector<2x32xf32>
    %34 = arith.addf %28, %33 : vector<2x32xf32>
    %c6 = arith.constant 6 : index
    %35 = memref.load %arg1[%c6] : memref<36xf32, #tpu.memory_space<smem>>
    %c0_18 = arith.constant 0 : index
    %c6_19 = arith.constant 6 : index
    %c0_20 = arith.constant 0 : index
    %36 = vector.load %arg2[%c0_18, %c6_19, %c0_20] : memref<2x36x32xf32, #tpu.memory_space<vmem>>, vector<2x1x32xf32>
    %37 = vector.shape_cast %36 : vector<2x1x32xf32> to vector<2x32xf32>
    %38 = vector.broadcast %35 : f32 to vector<2x32xf32>
    %39 = arith.mulf %38, %37 : vector<2x32xf32>
    %40 = arith.addf %34, %39 : vector<2x32xf32>
    %c7 = arith.constant 7 : index
    %41 = memref.load %arg1[%c7] : memref<36xf32, #tpu.memory_space<smem>>
    %c0_21 = arith.constant 0 : index
    %c7_22 = arith.constant 7 : index
    %c0_23 = arith.constant 0 : index
    %42 = vector.load %arg2[%c0_21, %c7_22, %c0_23] : memref<2x36x32xf32, #tpu.memory_space<vmem>>, vector<2x1x32xf32>
    %43 = vector.shape_cast %42 : vector<2x1x32xf32> to vector<2x32xf32>
    %44 = vector.broadcast %41 : f32 to vector<2x32xf32>
    %45 = arith.mulf %44, %43 : vector<2x32xf32>
    %46 = arith.addf %40, %45 : vector<2x32xf32>
    %c8 = arith.constant 8 : index
    %47 = memref.load %arg1[%c8] : memref<36xf32, #tpu.memory_space<smem>>
    %c0_24 = arith.constant 0 : index
    %c8_25 = arith.constant 8 : index
    %c0_26 = arith.constant 0 : index
    %48 = vector.load %arg2[%c0_24, %c8_25, %c0_26] : memref<2x36x32xf32, #tpu.memory_space<vmem>>, vector<2x1x32xf32>
    %49 = vector.shape_cast %48 : vector<2x1x32xf32> to vector<2x32xf32>
    %50 = vector.broadcast %47 : f32 to vector<2x32xf32>
    %51 = arith.mulf %50, %49 : vector<2x32xf32>
    %52 = arith.addf %46, %51 : vector<2x32xf32>
    %c9 = arith.constant 9 : index
    %53 = memref.load %arg1[%c9] : memref<36xf32, #tpu.memory_space<smem>>
    %c0_27 = arith.constant 0 : index
    %c9_28 = arith.constant 9 : index
    %c0_29 = arith.constant 0 : index
    %54 = vector.load %arg2[%c0_27, %c9_28, %c0_29] : memref<2x36x32xf32, #tpu.memory_space<vmem>>, vector<2x1x32xf32>
    %55 = vector.shape_cast %54 : vector<2x1x32xf32> to vector<2x32xf32>
    %56 = vector.broadcast %53 : f32 to vector<2x32xf32>
    %57 = arith.mulf %56, %55 : vector<2x32xf32>
    %58 = arith.addf %52, %57 : vector<2x32xf32>
    %c10 = arith.constant 10 : index
    %59 = memref.load %arg1[%c10] : memref<36xf32, #tpu.memory_space<smem>>
    %c0_30 = arith.constant 0 : index
    %c10_31 = arith.constant 10 : index
    %c0_32 = arith.constant 0 : index
    %60 = vector.load %arg2[%c0_30, %c10_31, %c0_32] : memref<2x36x32xf32, #tpu.memory_space<vmem>>, vector<2x1x32xf32>
    %61 = vector.shape_cast %60 : vector<2x1x32xf32> to vector<2x32xf32>
    %62 = vector.broadcast %59 : f32 to vector<2x32xf32>
    %63 = arith.mulf %62, %61 : vector<2x32xf32>
    %64 = arith.addf %58, %63 : vector<2x32xf32>
    %c11 = arith.constant 11 : index
    %65 = memref.load %arg1[%c11] : memref<36xf32, #tpu.memory_space<smem>>
    %c0_33 = arith.constant 0 : index
    %c11_34 = arith.constant 11 : index
    %c0_35 = arith.constant 0 : index
    %66 = vector.load %arg2[%c0_33, %c11_34, %c0_35] : memref<2x36x32xf32, #tpu.memory_space<vmem>>, vector<2x1x32xf32>
    %67 = vector.shape_cast %66 : vector<2x1x32xf32> to vector<2x32xf32>
    %68 = vector.broadcast %65 : f32 to vector<2x32xf32>
    %69 = arith.mulf %68, %67 : vector<2x32xf32>
    %70 = arith.addf %64, %69 : vector<2x32xf32>
    %c12 = arith.constant 12 : index
    %71 = memref.load %arg1[%c12] : memref<36xf32, #tpu.memory_space<smem>>
    %c0_36 = arith.constant 0 : index
    %c12_37 = arith.constant 12 : index
    %c0_38 = arith.constant 0 : index
    %72 = vector.load %arg2[%c0_36, %c12_37, %c0_38] : memref<2x36x32xf32, #tpu.memory_space<vmem>>, vector<2x1x32xf32>
    %73 = vector.shape_cast %72 : vector<2x1x32xf32> to vector<2x32xf32>
    %74 = vector.broadcast %71 : f32 to vector<2x32xf32>
    %75 = arith.mulf %74, %73 : vector<2x32xf32>
    %76 = arith.addf %70, %75 : vector<2x32xf32>
    %c13 = arith.constant 13 : index
    %77 = memref.load %arg1[%c13] : memref<36xf32, #tpu.memory_space<smem>>
    %c0_39 = arith.constant 0 : index
    %c13_40 = arith.constant 13 : index
    %c0_41 = arith.constant 0 : index
    %78 = vector.load %arg2[%c0_39, %c13_40, %c0_41] : memref<2x36x32xf32, #tpu.memory_space<vmem>>, vector<2x1x32xf32>
    %79 = vector.shape_cast %78 : vector<2x1x32xf32> to vector<2x32xf32>
    %80 = vector.broadcast %77 : f32 to vector<2x32xf32>
    %81 = arith.mulf %80, %79 : vector<2x32xf32>
    %82 = arith.addf %76, %81 : vector<2x32xf32>
    %c14 = arith.constant 14 : index
    %83 = memref.load %arg1[%c14] : memref<36xf32, #tpu.memory_space<smem>>
    %c0_42 = arith.constant 0 : index
    %c14_43 = arith.constant 14 : index
    %c0_44 = arith.constant 0 : index
    %84 = vector.load %arg2[%c0_42, %c14_43, %c0_44] : memref<2x36x32xf32, #tpu.memory_space<vmem>>, vector<2x1x32xf32>
    %85 = vector.shape_cast %84 : vector<2x1x32xf32> to vector<2x32xf32>
    %86 = vector.broadcast %83 : f32 to vector<2x32xf32>
    %87 = arith.mulf %86, %85 : vector<2x32xf32>
    %88 = arith.addf %82, %87 : vector<2x32xf32>
    %c15 = arith.constant 15 : index
    %89 = memref.load %arg1[%c15] : memref<36xf32, #tpu.memory_space<smem>>
    %c0_45 = arith.constant 0 : index
    %c15_46 = arith.constant 15 : index
    %c0_47 = arith.constant 0 : index
    %90 = vector.load %arg2[%c0_45, %c15_46, %c0_47] : memref<2x36x32xf32, #tpu.memory_space<vmem>>, vector<2x1x32xf32>
    %91 = vector.shape_cast %90 : vector<2x1x32xf32> to vector<2x32xf32>
    %92 = vector.broadcast %89 : f32 to vector<2x32xf32>
    %93 = arith.mulf %92, %91 : vector<2x32xf32>
    %94 = arith.addf %88, %93 : vector<2x32xf32>
    %c16 = arith.constant 16 : index
    %95 = memref.load %arg1[%c16] : memref<36xf32, #tpu.memory_space<smem>>
    %c0_48 = arith.constant 0 : index
    %c16_49 = arith.constant 16 : index
    %c0_50 = arith.constant 0 : index
    %96 = vector.load %arg2[%c0_48, %c16_49, %c0_50] : memref<2x36x32xf32, #tpu.memory_space<vmem>>, vector<2x1x32xf32>
    %97 = vector.shape_cast %96 : vector<2x1x32xf32> to vector<2x32xf32>
    %98 = vector.broadcast %95 : f32 to vector<2x32xf32>
    %99 = arith.mulf %98, %97 : vector<2x32xf32>
    %100 = arith.addf %94, %99 : vector<2x32xf32>
    %c17 = arith.constant 17 : index
    %101 = memref.load %arg1[%c17] : memref<36xf32, #tpu.memory_space<smem>>
    %c0_51 = arith.constant 0 : index
    %c17_52 = arith.constant 17 : index
    %c0_53 = arith.constant 0 : index
    %102 = vector.load %arg2[%c0_51, %c17_52, %c0_53] : memref<2x36x32xf32, #tpu.memory_space<vmem>>, vector<2x1x32xf32>
    %103 = vector.shape_cast %102 : vector<2x1x32xf32> to vector<2x32xf32>
    %104 = vector.broadcast %101 : f32 to vector<2x32xf32>
    %105 = arith.mulf %104, %103 : vector<2x32xf32>
    %106 = arith.addf %100, %105 : vector<2x32xf32>
    %c18 = arith.constant 18 : index
    %107 = memref.load %arg1[%c18] : memref<36xf32, #tpu.memory_space<smem>>
    %c0_54 = arith.constant 0 : index
    %c18_55 = arith.constant 18 : index
    %c0_56 = arith.constant 0 : index
    %108 = vector.load %arg2[%c0_54, %c18_55, %c0_56] : memref<2x36x32xf32, #tpu.memory_space<vmem>>, vector<2x1x32xf32>
    %109 = vector.shape_cast %108 : vector<2x1x32xf32> to vector<2x32xf32>
    %110 = vector.broadcast %107 : f32 to vector<2x32xf32>
    %111 = arith.mulf %110, %109 : vector<2x32xf32>
    %112 = arith.addf %106, %111 : vector<2x32xf32>
    %c19 = arith.constant 19 : index
    %113 = memref.load %arg1[%c19] : memref<36xf32, #tpu.memory_space<smem>>
    %c0_57 = arith.constant 0 : index
    %c19_58 = arith.constant 19 : index
    %c0_59 = arith.constant 0 : index
    %114 = vector.load %arg2[%c0_57, %c19_58, %c0_59] : memref<2x36x32xf32, #tpu.memory_space<vmem>>, vector<2x1x32xf32>
    %115 = vector.shape_cast %114 : vector<2x1x32xf32> to vector<2x32xf32>
    %116 = vector.broadcast %113 : f32 to vector<2x32xf32>
    %117 = arith.mulf %116, %115 : vector<2x32xf32>
    %118 = arith.addf %112, %117 : vector<2x32xf32>
    %c20 = arith.constant 20 : index
    %119 = memref.load %arg1[%c20] : memref<36xf32, #tpu.memory_space<smem>>
    %c0_60 = arith.constant 0 : index
    %c20_61 = arith.constant 20 : index
    %c0_62 = arith.constant 0 : index
    %120 = vector.load %arg2[%c0_60, %c20_61, %c0_62] : memref<2x36x32xf32, #tpu.memory_space<vmem>>, vector<2x1x32xf32>
    %121 = vector.shape_cast %120 : vector<2x1x32xf32> to vector<2x32xf32>
    %122 = vector.broadcast %119 : f32 to vector<2x32xf32>
    %123 = arith.mulf %122, %121 : vector<2x32xf32>
    %124 = arith.addf %118, %123 : vector<2x32xf32>
    %c21 = arith.constant 21 : index
    %125 = memref.load %arg1[%c21] : memref<36xf32, #tpu.memory_space<smem>>
    %c0_63 = arith.constant 0 : index
    %c21_64 = arith.constant 21 : index
    %c0_65 = arith.constant 0 : index
    %126 = vector.load %arg2[%c0_63, %c21_64, %c0_65] : memref<2x36x32xf32, #tpu.memory_space<vmem>>, vector<2x1x32xf32>
    %127 = vector.shape_cast %126 : vector<2x1x32xf32> to vector<2x32xf32>
    %128 = vector.broadcast %125 : f32 to vector<2x32xf32>
    %129 = arith.mulf %128, %127 : vector<2x32xf32>
    %130 = arith.addf %124, %129 : vector<2x32xf32>
    %c22 = arith.constant 22 : index
    %131 = memref.load %arg1[%c22] : memref<36xf32, #tpu.memory_space<smem>>
    %c0_66 = arith.constant 0 : index
    %c22_67 = arith.constant 22 : index
    %c0_68 = arith.constant 0 : index
    %132 = vector.load %arg2[%c0_66, %c22_67, %c0_68] : memref<2x36x32xf32, #tpu.memory_space<vmem>>, vector<2x1x32xf32>
    %133 = vector.shape_cast %132 : vector<2x1x32xf32> to vector<2x32xf32>
    %134 = vector.broadcast %131 : f32 to vector<2x32xf32>
    %135 = arith.mulf %134, %133 : vector<2x32xf32>
    %136 = arith.addf %130, %135 : vector<2x32xf32>
    %c23 = arith.constant 23 : index
    %137 = memref.load %arg1[%c23] : memref<36xf32, #tpu.memory_space<smem>>
    %c0_69 = arith.constant 0 : index
    %c23_70 = arith.constant 23 : index
    %c0_71 = arith.constant 0 : index
    %138 = vector.load %arg2[%c0_69, %c23_70, %c0_71] : memref<2x36x32xf32, #tpu.memory_space<vmem>>, vector<2x1x32xf32>
    %139 = vector.shape_cast %138 : vector<2x1x32xf32> to vector<2x32xf32>
    %140 = vector.broadcast %137 : f32 to vector<2x32xf32>
    %141 = arith.mulf %140, %139 : vector<2x32xf32>
    %142 = arith.addf %136, %141 : vector<2x32xf32>
    %c24 = arith.constant 24 : index
    %143 = memref.load %arg1[%c24] : memref<36xf32, #tpu.memory_space<smem>>
    %c0_72 = arith.constant 0 : index
    %c24_73 = arith.constant 24 : index
    %c0_74 = arith.constant 0 : index
    %144 = vector.load %arg2[%c0_72, %c24_73, %c0_74] : memref<2x36x32xf32, #tpu.memory_space<vmem>>, vector<2x1x32xf32>
    %145 = vector.shape_cast %144 : vector<2x1x32xf32> to vector<2x32xf32>
    %146 = vector.broadcast %143 : f32 to vector<2x32xf32>
    %147 = arith.mulf %146, %145 : vector<2x32xf32>
    %148 = arith.addf %142, %147 : vector<2x32xf32>
    %c25 = arith.constant 25 : index
    %149 = memref.load %arg1[%c25] : memref<36xf32, #tpu.memory_space<smem>>
    %c0_75 = arith.constant 0 : index
    %c25_76 = arith.constant 25 : index
    %c0_77 = arith.constant 0 : index
    %150 = vector.load %arg2[%c0_75, %c25_76, %c0_77] : memref<2x36x32xf32, #tpu.memory_space<vmem>>, vector<2x1x32xf32>
    %151 = vector.shape_cast %150 : vector<2x1x32xf32> to vector<2x32xf32>
    %152 = vector.broadcast %149 : f32 to vector<2x32xf32>
    %153 = arith.mulf %152, %151 : vector<2x32xf32>
    %154 = arith.addf %148, %153 : vector<2x32xf32>
    %c26 = arith.constant 26 : index
    %155 = memref.load %arg1[%c26] : memref<36xf32, #tpu.memory_space<smem>>
    %c0_78 = arith.constant 0 : index
    %c26_79 = arith.constant 26 : index
    %c0_80 = arith.constant 0 : index
    %156 = vector.load %arg2[%c0_78, %c26_79, %c0_80] : memref<2x36x32xf32, #tpu.memory_space<vmem>>, vector<2x1x32xf32>
    %157 = vector.shape_cast %156 : vector<2x1x32xf32> to vector<2x32xf32>
    %158 = vector.broadcast %155 : f32 to vector<2x32xf32>
    %159 = arith.mulf %158, %157 : vector<2x32xf32>
    %160 = arith.addf %154, %159 : vector<2x32xf32>
    %c27 = arith.constant 27 : index
    %161 = memref.load %arg1[%c27] : memref<36xf32, #tpu.memory_space<smem>>
    %c0_81 = arith.constant 0 : index
    %c27_82 = arith.constant 27 : index
    %c0_83 = arith.constant 0 : index
    %162 = vector.load %arg2[%c0_81, %c27_82, %c0_83] : memref<2x36x32xf32, #tpu.memory_space<vmem>>, vector<2x1x32xf32>
    %163 = vector.shape_cast %162 : vector<2x1x32xf32> to vector<2x32xf32>
    %164 = vector.broadcast %161 : f32 to vector<2x32xf32>
    %165 = arith.mulf %164, %163 : vector<2x32xf32>
    %166 = arith.addf %160, %165 : vector<2x32xf32>
    %c28 = arith.constant 28 : index
    %167 = memref.load %arg1[%c28] : memref<36xf32, #tpu.memory_space<smem>>
    %c0_84 = arith.constant 0 : index
    %c28_85 = arith.constant 28 : index
    %c0_86 = arith.constant 0 : index
    %168 = vector.load %arg2[%c0_84, %c28_85, %c0_86] : memref<2x36x32xf32, #tpu.memory_space<vmem>>, vector<2x1x32xf32>
    %169 = vector.shape_cast %168 : vector<2x1x32xf32> to vector<2x32xf32>
    %170 = vector.broadcast %167 : f32 to vector<2x32xf32>
    %171 = arith.mulf %170, %169 : vector<2x32xf32>
    %172 = arith.addf %166, %171 : vector<2x32xf32>
    %c29 = arith.constant 29 : index
    %173 = memref.load %arg1[%c29] : memref<36xf32, #tpu.memory_space<smem>>
    %c0_87 = arith.constant 0 : index
    %c29_88 = arith.constant 29 : index
    %c0_89 = arith.constant 0 : index
    %174 = vector.load %arg2[%c0_87, %c29_88, %c0_89] : memref<2x36x32xf32, #tpu.memory_space<vmem>>, vector<2x1x32xf32>
    %175 = vector.shape_cast %174 : vector<2x1x32xf32> to vector<2x32xf32>
    %176 = vector.broadcast %173 : f32 to vector<2x32xf32>
    %177 = arith.mulf %176, %175 : vector<2x32xf32>
    %178 = arith.addf %172, %177 : vector<2x32xf32>
    %c30 = arith.constant 30 : index
    %179 = memref.load %arg1[%c30] : memref<36xf32, #tpu.memory_space<smem>>
    %c0_90 = arith.constant 0 : index
    %c30_91 = arith.constant 30 : index
    %c0_92 = arith.constant 0 : index
    %180 = vector.load %arg2[%c0_90, %c30_91, %c0_92] : memref<2x36x32xf32, #tpu.memory_space<vmem>>, vector<2x1x32xf32>
    %181 = vector.shape_cast %180 : vector<2x1x32xf32> to vector<2x32xf32>
    %182 = vector.broadcast %179 : f32 to vector<2x32xf32>
    %183 = arith.mulf %182, %181 : vector<2x32xf32>
    %184 = arith.addf %178, %183 : vector<2x32xf32>
    %c31 = arith.constant 31 : index
    %185 = memref.load %arg1[%c31] : memref<36xf32, #tpu.memory_space<smem>>
    %c0_93 = arith.constant 0 : index
    %c31_94 = arith.constant 31 : index
    %c0_95 = arith.constant 0 : index
    %186 = vector.load %arg2[%c0_93, %c31_94, %c0_95] : memref<2x36x32xf32, #tpu.memory_space<vmem>>, vector<2x1x32xf32>
    %187 = vector.shape_cast %186 : vector<2x1x32xf32> to vector<2x32xf32>
    %188 = vector.broadcast %185 : f32 to vector<2x32xf32>
    %189 = arith.mulf %188, %187 : vector<2x32xf32>
    %190 = arith.addf %184, %189 : vector<2x32xf32>
    %c32 = arith.constant 32 : index
    %191 = memref.load %arg1[%c32] : memref<36xf32, #tpu.memory_space<smem>>
    %c0_96 = arith.constant 0 : index
    %c32_97 = arith.constant 32 : index
    %c0_98 = arith.constant 0 : index
    %192 = vector.load %arg2[%c0_96, %c32_97, %c0_98] : memref<2x36x32xf32, #tpu.memory_space<vmem>>, vector<2x1x32xf32>
    %193 = vector.shape_cast %192 : vector<2x1x32xf32> to vector<2x32xf32>
    %194 = vector.broadcast %191 : f32 to vector<2x32xf32>
    %195 = arith.mulf %194, %193 : vector<2x32xf32>
    %196 = arith.addf %190, %195 : vector<2x32xf32>
    %c33 = arith.constant 33 : index
    %197 = memref.load %arg1[%c33] : memref<36xf32, #tpu.memory_space<smem>>
    %c0_99 = arith.constant 0 : index
    %c33_100 = arith.constant 33 : index
    %c0_101 = arith.constant 0 : index
    %198 = vector.load %arg2[%c0_99, %c33_100, %c0_101] : memref<2x36x32xf32, #tpu.memory_space<vmem>>, vector<2x1x32xf32>
    %199 = vector.shape_cast %198 : vector<2x1x32xf32> to vector<2x32xf32>
    %200 = vector.broadcast %197 : f32 to vector<2x32xf32>
    %201 = arith.mulf %200, %199 : vector<2x32xf32>
    %202 = arith.addf %196, %201 : vector<2x32xf32>
    %c34 = arith.constant 34 : index
    %203 = memref.load %arg1[%c34] : memref<36xf32, #tpu.memory_space<smem>>
    %c0_102 = arith.constant 0 : index
    %c34_103 = arith.constant 34 : index
    %c0_104 = arith.constant 0 : index
    %204 = vector.load %arg2[%c0_102, %c34_103, %c0_104] : memref<2x36x32xf32, #tpu.memory_space<vmem>>, vector<2x1x32xf32>
    %205 = vector.shape_cast %204 : vector<2x1x32xf32> to vector<2x32xf32>
    %206 = vector.broadcast %203 : f32 to vector<2x32xf32>
    %207 = arith.mulf %206, %205 : vector<2x32xf32>
    %208 = arith.addf %202, %207 : vector<2x32xf32>
    %c35 = arith.constant 35 : index
    %209 = memref.load %arg1[%c35] : memref<36xf32, #tpu.memory_space<smem>>
    %c0_105 = arith.constant 0 : index
    %c35_106 = arith.constant 35 : index
    %c0_107 = arith.constant 0 : index
    %210 = vector.load %arg2[%c0_105, %c35_106, %c0_107] : memref<2x36x32xf32, #tpu.memory_space<vmem>>, vector<2x1x32xf32>
    %211 = vector.shape_cast %210 : vector<2x1x32xf32> to vector<2x32xf32>
    %212 = vector.broadcast %209 : f32 to vector<2x32xf32>
    %213 = arith.mulf %212, %211 : vector<2x32xf32>
    %214 = arith.addf %208, %213 : vector<2x32xf32>
    %c0_108 = arith.constant 0 : index
    %c0_109 = arith.constant 0 : index
    %215 = vector.load %arg3[%c0_108, %c0_109] : memref<32x128xf32, #tpu.memory_space<vmem>>, vector<32x128xf32>
    %cst = arith.constant dense<0.000000e+00> : vector<2x128xf32>
    %216 = tpu.matmul %214, %215, %cst {dimension_numbers = #tpu.dot_dimension_numbers<[1], [0], [0], [1], [0, 0, 1, 1], [], []>} : vector<2x32xf32>, vector<32x128xf32>, vector<2x128xf32> -> vector<2x128xf32>
    %c0_110 = arith.constant 0 : index
    %c0_111 = arith.constant 0 : index
    %217 = vector.load %arg4[%c0_110, %c0_111] : memref<1x128xf32, #tpu.memory_space<vmem>>, vector<1x128xf32>
    %218 = vector.broadcast %217 : vector<1x128xf32> to vector<2x128xf32>
    %219 = arith.addf %216, %218 : vector<2x128xf32>
    %220 = arith.mulf %219, %219 : vector<2x128xf32>
    %cst_112 = arith.constant dense<0.000000e+00> : vector<2xf32>
    %221 = vector.multi_reduction <add>, %220, %cst_112 [1] : vector<2x128xf32> to vector<2xf32>
    %222 = vector.shape_cast %221 : vector<2xf32> to vector<2x1xf32>
    %223 = math.sqrt %222 : vector<2x1xf32>
    %cst_113 = arith.constant 9.99999993E-9 : f32
    %224 = vector.broadcast %cst_113 : f32 to vector<2x1xf32>
    %225 = arith.addf %223, %224 : vector<2x1xf32>
    %226 = tpu.reciprocal %225 {approx = true} : vector<2x1xf32> -> vector<2x1xf32>
    %227 = vector.broadcast %226 : vector<2x1xf32> to vector<2x128xf32>
    %228 = arith.mulf %219, %227 : vector<2x128xf32>
    %c0_114 = arith.constant 0 : index
    %c0_115 = arith.constant 0 : index
    %229 = vector.load %arg5[%c0_114, %c0_115] : memref<2x128xf32, #tpu.memory_space<vmem>>, vector<2x128xf32>
    tpu.vector_store %arg5[%c0_114, %c0_115], %228 {strides = array<i32>} : memref<2x128xf32, #tpu.memory_space<vmem>>, vector<2x128xf32>,
    return
  }
  func.func @transform_0(%arg0: i32) -> i32 {
    %c0_i32 = arith.constant 0 : i32
    %c0_i32_0 = arith.constant 0 : i32
    return %c0_i32 : i32
  }
  func.func @transform_1(%arg0: i32) -> (i32, i32, i32) {
    %c0_i32 = arith.constant 0 : i32
    %c0_i32_0 = arith.constant 0 : i32
    %c0_i32_1 = arith.constant 0 : i32
    return %arg0, %c0_i32, %c0_i32_0 : i32, i32, i32
  }
  func.func @transform_2(%arg0: i32) -> (i32, i32) {
    %c0_i32 = arith.constant 0 : i32
    %c0_i32_0 = arith.constant 0 : i32
    %c0_i32_1 = arith.constant 0 : i32
    return %c0_i32, %c0_i32_0 : i32, i32
  }
  func.func @transform_3(%arg0: i32) -> (i32, i32) {
    %c0_i32 = arith.constant 0 : i32
    %c0_i32_0 = arith.constant 0 : i32
    %c0_i32_1 = arith.constant 0 : i32
    return %c0_i32, %c0_i32_0 : i32, i32
  }
  func.func @transform_4(%arg0: i32) -> (i32, i32) {
    %c0_i32 = arith.constant 0 : i32
    %c0_i32_0 = arith.constant 0 : i32
    return %arg0, %c0_i32 : i32, i32
  }
}

module attributes {stable_mosaic.version = 11 : i64} {
  func.func @_encoder_image_global_kernel(%arg0: i32, %arg1: memref<36xf32, #tpu.memory_space<smem>>, %arg2: memref<2x36x32xf32, #tpu.memory_space<vmem>>, %arg3: memref<32x128xf32, #tpu.memory_space<vmem>>, %arg4: memref<1x128xf32, #tpu.memory_space<vmem>>, %arg5: memref<2x128xf32, #tpu.memory_space<vmem>>) attributes {dimension_semantics = [#tpu.dimension_semantics<parallel>], iteration_bounds = array<i64: 1>, scalar_prefetch = 0 : i64, scratch_operands = 0 : i64, tpu.core_type = #tpu.core_type<tc>, window_params = [{transform_indices = @transform_0, window_bounds = array<i64: 36>}, {transform_indices = @transform_1, window_bounds = array<i64: 2, 36, 32>}, {pipeline_mode = #tpu.pipeline_mode<synchronous>, transform_indices = @transform_2, window_bounds = array<i64: 32, 128>}, {pipeline_mode = #tpu.pipeline_mode<synchronous>, transform_indices = @transform_3, window_bounds = array<i64: 1, 128>}, {transform_indices = @transform_4, window_bounds = array<i64: 2, 128>}]} {
    %c0 = arith.constant 0 : index
    %0 = memref.load %arg1[%c0] : memref<36xf32, #tpu.memory_space<smem>>
    %c0_0 = arith.constant 0 : index
    %c0_1 = arith.constant 0 : index
    %c0_2 = arith.constant 0 : index
    %1 = vector.load %arg2[%c0_0, %c0_1, %c0_2] : memref<2x36x32xf32, #tpu.memory_space<vmem>>, vector<2x1x32xf32>
    %2 = vector.shape_cast %1 : vector<2x1x32xf32> to vector<2x32xf32>
    %3 = vector.broadcast %0 : f32 to vector<2x32xf32>
    %4 = arith.mulf %3, %2 : vector<2x32xf32>
    %c1 = arith.constant 1 : index
    %5 = memref.load %arg1[%c1] : memref<36xf32, #tpu.memory_space<smem>>
    %c0_3 = arith.constant 0 : index
    %c1_4 = arith.constant 1 : index
    %c0_5 = arith.constant 0 : index
    %6 = vector.load %arg2[%c0_3, %c1_4, %c0_5] : memref<2x36x32xf32, #tpu.memory_space<vmem>>, vector<2x1x32xf32>
    %7 = vector.shape_cast %6 : vector<2x1x32xf32> to vector<2x32xf32>
    %8 = vector.broadcast %5 : f32 to vector<2x32xf32>
    %9 = arith.mulf %8, %7 : vector<2x32xf32>
    %10 = arith.addf %4, %9 : vector<2x32xf32>
    %c2 = arith.constant 2 : index
    %11 = memref.load %arg1[%c2] : memref<36xf32, #tpu.memory_space<smem>>
    %c0_6 = arith.constant 0 : index
    %c2_7 = arith.constant 2 : index
    %c0_8 = arith.constant 0 : index
    %12 = vector.load %arg2[%c0_6, %c2_7, %c0_8] : memref<2x36x32xf32, #tpu.memory_space<vmem>>, vector<2x1x32xf32>
    %13 = vector.shape_cast %12 : vector<2x1x32xf32> to vector<2x32xf32>
    %14 = vector.broadcast %11 : f32 to vector<2x32xf32>
    %15 = arith.mulf %14, %13 : vector<2x32xf32>
    %16 = arith.addf %10, %15 : vector<2x32xf32>
    %c3 = arith.constant 3 : index
    %17 = memref.load %arg1[%c3] : memref<36xf32, #tpu.memory_space<smem>>
    %c0_9 = arith.constant 0 : index
    %c3_10 = arith.constant 3 : index
    %c0_11 = arith.constant 0 : index
    %18 = vector.load %arg2[%c0_9, %c3_10, %c0_11] : memref<2x36x32xf32, #tpu.memory_space<vmem>>, vector<2x1x32xf32>
    %19 = vector.shape_cast %18 : vector<2x1x32xf32> to vector<2x32xf32>
    %20 = vector.broadcast %17 : f32 to vector<2x32xf32>
    %21 = arith.mulf %20, %19 : vector<2x32xf32>
    %22 = arith.addf %16, %21 : vector<2x32xf32>
    %c4 = arith.constant 4 : index
    %23 = memref.load %arg1[%c4] : memref<36xf32, #tpu.memory_space<smem>>
    %c0_12 = arith.constant 0 : index
    %c4_13 = arith.constant 4 : index
    %c0_14 = arith.constant 0 : index
    %24 = vector.load %arg2[%c0_12, %c4_13, %c0_14] : memref<2x36x32xf32, #tpu.memory_space<vmem>>, vector<2x1x32xf32>
    %25 = vector.shape_cast %24 : vector<2x1x32xf32> to vector<2x32xf32>
    %26 = vector.broadcast %23 : f32 to vector<2x32xf32>
    %27 = arith.mulf %26, %25 : vector<2x32xf32>
    %28 = arith.addf %22, %27 : vector<2x32xf32>
    %c5 = arith.constant 5 : index
    %29 = memref.load %arg1[%c5] : memref<36xf32, #tpu.memory_space<smem>>
    %c0_15 = arith.constant 0 : index
    %c5_16 = arith.constant 5 : index
    %c0_17 = arith.constant 0 : index
    %30 = vector.load %arg2[%c0_15, %c5_16, %c0_17] : memref<2x36x32xf32, #tpu.memory_space<vmem>>, vector<2x1x32xf32>
    %31 = vector.shape_cast %30 : vector<2x1x32xf32> to vector<2x32xf32>
    %32 = vector.broadcast %29 : f32 to vector<2x32xf32>
    %33 = arith.mulf %32, %31 : vector<2x32xf32>
    %34 = arith.addf %28, %33 : vector<2x32xf32>
    %c6 = arith.constant 6 : index
    %35 = memref.load %arg1[%c6] : memref<36xf32, #tpu.memory_space<smem>>
    %c0_18 = arith.constant 0 : index
    %c6_19 = arith.constant 6 : index
    %c0_20 = arith.constant 0 : index
    %36 = vector.load %arg2[%c0_18, %c6_19, %c0_20] : memref<2x36x32xf32, #tpu.memory_space<vmem>>, vector<2x1x32xf32>
    %37 = vector.shape_cast %36 : vector<2x1x32xf32> to vector<2x32xf32>
    %38 = vector.broadcast %35 : f32 to vector<2x32xf32>
    %39 = arith.mulf %38, %37 : vector<2x32xf32>
    %40 = arith.addf %34, %39 : vector<2x32xf32>
    %c7 = arith.constant 7 : index
    %41 = memref.load %arg1[%c7] : memref<36xf32, #tpu.memory_space<smem>>
    %c0_21 = arith.constant 0 : index
    %c7_22 = arith.constant 7 : index
    %c0_23 = arith.constant 0 : index
    %42 = vector.load %arg2[%c0_21, %c7_22, %c0_23] : memref<2x36x32xf32, #tpu.memory_space<vmem>>, vector<2x1x32xf32>
    %43 = vector.shape_cast %42 : vector<2x1x32xf32> to vector<2x32xf32>
    %44 = vector.broadcast %41 : f32 to vector<2x32xf32>
    %45 = arith.mulf %44, %43 : vector<2x32xf32>
    %46 = arith.addf %40, %45 : vector<2x32xf32>
    %c8 = arith.constant 8 : index
    %47 = memref.load %arg1[%c8] : memref<36xf32, #tpu.memory_space<smem>>
    %c0_24 = arith.constant 0 : index
    %c8_25 = arith.constant 8 : index
    %c0_26 = arith.constant 0 : index
    %48 = vector.load %arg2[%c0_24, %c8_25, %c0_26] : memref<2x36x32xf32, #tpu.memory_space<vmem>>, vector<2x1x32xf32>
    %49 = vector.shape_cast %48 : vector<2x1x32xf32> to vector<2x32xf32>
    %50 = vector.broadcast %47 : f32 to vector<2x32xf32>
    %51 = arith.mulf %50, %49 : vector<2x32xf32>
    %52 = arith.addf %46, %51 : vector<2x32xf32>
    %c9 = arith.constant 9 : index
    %53 = memref.load %arg1[%c9] : memref<36xf32, #tpu.memory_space<smem>>
    %c0_27 = arith.constant 0 : index
    %c9_28 = arith.constant 9 : index
    %c0_29 = arith.constant 0 : index
    %54 = vector.load %arg2[%c0_27, %c9_28, %c0_29] : memref<2x36x32xf32, #tpu.memory_space<vmem>>, vector<2x1x32xf32>
    %55 = vector.shape_cast %54 : vector<2x1x32xf32> to vector<2x32xf32>
    %56 = vector.broadcast %53 : f32 to vector<2x32xf32>
    %57 = arith.mulf %56, %55 : vector<2x32xf32>
    %58 = arith.addf %52, %57 : vector<2x32xf32>
    %c10 = arith.constant 10 : index
    %59 = memref.load %arg1[%c10] : memref<36xf32, #tpu.memory_space<smem>>
    %c0_30 = arith.constant 0 : index
    %c10_31 = arith.constant 10 : index
    %c0_32 = arith.constant 0 : index
    %60 = vector.load %arg2[%c0_30, %c10_31, %c0_32] : memref<2x36x32xf32, #tpu.memory_space<vmem>>, vector<2x1x32xf32>
    %61 = vector.shape_cast %60 : vector<2x1x32xf32> to vector<2x32xf32>
    %62 = vector.broadcast %59 : f32 to vector<2x32xf32>
    %63 = arith.mulf %62, %61 : vector<2x32xf32>
    %64 = arith.addf %58, %63 : vector<2x32xf32>
    %c11 = arith.constant 11 : index
    %65 = memref.load %arg1[%c11] : memref<36xf32, #tpu.memory_space<smem>>
    %c0_33 = arith.constant 0 : index
    %c11_34 = arith.constant 11 : index
    %c0_35 = arith.constant 0 : index
    %66 = vector.load %arg2[%c0_33, %c11_34, %c0_35] : memref<2x36x32xf32, #tpu.memory_space<vmem>>, vector<2x1x32xf32>
    %67 = vector.shape_cast %66 : vector<2x1x32xf32> to vector<2x32xf32>
    %68 = vector.broadcast %65 : f32 to vector<2x32xf32>
    %69 = arith.mulf %68, %67 : vector<2x32xf32>
    %70 = arith.addf %64, %69 : vector<2x32xf32>
    %c12 = arith.constant 12 : index
    %71 = memref.load %arg1[%c12] : memref<36xf32, #tpu.memory_space<smem>>
    %c0_36 = arith.constant 0 : index
    %c12_37 = arith.constant 12 : index
    %c0_38 = arith.constant 0 : index
    %72 = vector.load %arg2[%c0_36, %c12_37, %c0_38] : memref<2x36x32xf32, #tpu.memory_space<vmem>>, vector<2x1x32xf32>
    %73 = vector.shape_cast %72 : vector<2x1x32xf32> to vector<2x32xf32>
    %74 = vector.broadcast %71 : f32 to vector<2x32xf32>
    %75 = arith.mulf %74, %73 : vector<2x32xf32>
    %76 = arith.addf %70, %75 : vector<2x32xf32>
    %c13 = arith.constant 13 : index
    %77 = memref.load %arg1[%c13] : memref<36xf32, #tpu.memory_space<smem>>
    %c0_39 = arith.constant 0 : index
    %c13_40 = arith.constant 13 : index
    %c0_41 = arith.constant 0 : index
    %78 = vector.load %arg2[%c0_39, %c13_40, %c0_41] : memref<2x36x32xf32, #tpu.memory_space<vmem>>, vector<2x1x32xf32>
    %79 = vector.shape_cast %78 : vector<2x1x32xf32> to vector<2x32xf32>
    %80 = vector.broadcast %77 : f32 to vector<2x32xf32>
    %81 = arith.mulf %80, %79 : vector<2x32xf32>
    %82 = arith.addf %76, %81 : vector<2x32xf32>
    %c14 = arith.constant 14 : index
    %83 = memref.load %arg1[%c14] : memref<36xf32, #tpu.memory_space<smem>>
    %c0_42 = arith.constant 0 : index
    %c14_43 = arith.constant 14 : index
    %c0_44 = arith.constant 0 : index
    %84 = vector.load %arg2[%c0_42, %c14_43, %c0_44] : memref<2x36x32xf32, #tpu.memory_space<vmem>>, vector<2x1x32xf32>
    %85 = vector.shape_cast %84 : vector<2x1x32xf32> to vector<2x32xf32>
    %86 = vector.broadcast %83 : f32 to vector<2x32xf32>
    %87 = arith.mulf %86, %85 : vector<2x32xf32>
    %88 = arith.addf %82, %87 : vector<2x32xf32>
    %c15 = arith.constant 15 : index
    %89 = memref.load %arg1[%c15] : memref<36xf32, #tpu.memory_space<smem>>
    %c0_45 = arith.constant 0 : index
    %c15_46 = arith.constant 15 : index
    %c0_47 = arith.constant 0 : index
    %90 = vector.load %arg2[%c0_45, %c15_46, %c0_47] : memref<2x36x32xf32, #tpu.memory_space<vmem>>, vector<2x1x32xf32>
    %91 = vector.shape_cast %90 : vector<2x1x32xf32> to vector<2x32xf32>
    %92 = vector.broadcast %89 : f32 to vector<2x32xf32>
    %93 = arith.mulf %92, %91 : vector<2x32xf32>
    %94 = arith.addf %88, %93 : vector<2x32xf32>
    %c16 = arith.constant 16 : index
    %95 = memref.load %arg1[%c16] : memref<36xf32, #tpu.memory_space<smem>>
    %c0_48 = arith.constant 0 : index
    %c16_49 = arith.constant 16 : index
    %c0_50 = arith.constant 0 : index
    %96 = vector.load %arg2[%c0_48, %c16_49, %c0_50] : memref<2x36x32xf32, #tpu.memory_space<vmem>>, vector<2x1x32xf32>
    %97 = vector.shape_cast %96 : vector<2x1x32xf32> to vector<2x32xf32>
    %98 = vector.broadcast %95 : f32 to vector<2x32xf32>
    %99 = arith.mulf %98, %97 : vector<2x32xf32>
    %100 = arith.addf %94, %99 : vector<2x32xf32>
    %c17 = arith.constant 17 : index
    %101 = memref.load %arg1[%c17] : memref<36xf32, #tpu.memory_space<smem>>
    %c0_51 = arith.constant 0 : index
    %c17_52 = arith.constant 17 : index
    %c0_53 = arith.constant 0 : index
    %102 = vector.load %arg2[%c0_51, %c17_52, %c0_53] : memref<2x36x32xf32, #tpu.memory_space<vmem>>, vector<2x1x32xf32>
    %103 = vector.shape_cast %102 : vector<2x1x32xf32> to vector<2x32xf32>
    %104 = vector.broadcast %101 : f32 to vector<2x32xf32>
    %105 = arith.mulf %104, %103 : vector<2x32xf32>
    %106 = arith.addf %100, %105 : vector<2x32xf32>
    %c18 = arith.constant 18 : index
    %107 = memref.load %arg1[%c18] : memref<36xf32, #tpu.memory_space<smem>>
    %c0_54 = arith.constant 0 : index
    %c18_55 = arith.constant 18 : index
    %c0_56 = arith.constant 0 : index
    %108 = vector.load %arg2[%c0_54, %c18_55, %c0_56] : memref<2x36x32xf32, #tpu.memory_space<vmem>>, vector<2x1x32xf32>
    %109 = vector.shape_cast %108 : vector<2x1x32xf32> to vector<2x32xf32>
    %110 = vector.broadcast %107 : f32 to vector<2x32xf32>
    %111 = arith.mulf %110, %109 : vector<2x32xf32>
    %112 = arith.addf %106, %111 : vector<2x32xf32>
    %c19 = arith.constant 19 : index
    %113 = memref.load %arg1[%c19] : memref<36xf32, #tpu.memory_space<smem>>
    %c0_57 = arith.constant 0 : index
    %c19_58 = arith.constant 19 : index
    %c0_59 = arith.constant 0 : index
    %114 = vector.load %arg2[%c0_57, %c19_58, %c0_59] : memref<2x36x32xf32, #tpu.memory_space<vmem>>, vector<2x1x32xf32>
    %115 = vector.shape_cast %114 : vector<2x1x32xf32> to vector<2x32xf32>
    %116 = vector.broadcast %113 : f32 to vector<2x32xf32>
    %117 = arith.mulf %116, %115 : vector<2x32xf32>
    %118 = arith.addf %112, %117 : vector<2x32xf32>
    %c20 = arith.constant 20 : index
    %119 = memref.load %arg1[%c20] : memref<36xf32, #tpu.memory_space<smem>>
    %c0_60 = arith.constant 0 : index
    %c20_61 = arith.constant 20 : index
    %c0_62 = arith.constant 0 : index
    %120 = vector.load %arg2[%c0_60, %c20_61, %c0_62] : memref<2x36x32xf32, #tpu.memory_space<vmem>>, vector<2x1x32xf32>
    %121 = vector.shape_cast %120 : vector<2x1x32xf32> to vector<2x32xf32>
    %122 = vector.broadcast %119 : f32 to vector<2x32xf32>
    %123 = arith.mulf %122, %121 : vector<2x32xf32>
    %124 = arith.addf %118, %123 : vector<2x32xf32>
    %c21 = arith.constant 21 : index
    %125 = memref.load %arg1[%c21] : memref<36xf32, #tpu.memory_space<smem>>
    %c0_63 = arith.constant 0 : index
    %c21_64 = arith.constant 21 : index
    %c0_65 = arith.constant 0 : index
    %126 = vector.load %arg2[%c0_63, %c21_64, %c0_65] : memref<2x36x32xf32, #tpu.memory_space<vmem>>, vector<2x1x32xf32>
    %127 = vector.shape_cast %126 : vector<2x1x32xf32> to vector<2x32xf32>
    %128 = vector.broadcast %125 : f32 to vector<2x32xf32>
    %129 = arith.mulf %128, %127 : vector<2x32xf32>
    %130 = arith.addf %124, %129 : vector<2x32xf32>
    %c22 = arith.constant 22 : index
    %131 = memref.load %arg1[%c22] : memref<36xf32, #tpu.memory_space<smem>>
    %c0_66 = arith.constant 0 : index
    %c22_67 = arith.constant 22 : index
    %c0_68 = arith.constant 0 : index
    %132 = vector.load %arg2[%c0_66, %c22_67, %c0_68] : memref<2x36x32xf32, #tpu.memory_space<vmem>>, vector<2x1x32xf32>
    %133 = vector.shape_cast %132 : vector<2x1x32xf32> to vector<2x32xf32>
    %134 = vector.broadcast %131 : f32 to vector<2x32xf32>
    %135 = arith.mulf %134, %133 : vector<2x32xf32>
    %136 = arith.addf %130, %135 : vector<2x32xf32>
    %c23 = arith.constant 23 : index
    %137 = memref.load %arg1[%c23] : memref<36xf32, #tpu.memory_space<smem>>
    %c0_69 = arith.constant 0 : index
    %c23_70 = arith.constant 23 : index
    %c0_71 = arith.constant 0 : index
    %138 = vector.load %arg2[%c0_69, %c23_70, %c0_71] : memref<2x36x32xf32, #tpu.memory_space<vmem>>, vector<2x1x32xf32>
    %139 = vector.shape_cast %138 : vector<2x1x32xf32> to vector<2x32xf32>
    %140 = vector.broadcast %137 : f32 to vector<2x32xf32>
    %141 = arith.mulf %140, %139 : vector<2x32xf32>
    %142 = arith.addf %136, %141 : vector<2x32xf32>
    %c24 = arith.constant 24 : index
    %143 = memref.load %arg1[%c24] : memref<36xf32, #tpu.memory_space<smem>>
    %c0_72 = arith.constant 0 : index
    %c24_73 = arith.constant 24 : index
    %c0_74 = arith.constant 0 : index
    %144 = vector.load %arg2[%c0_72, %c24_73, %c0_74] : memref<2x36x32xf32, #tpu.memory_space<vmem>>, vector<2x1x32xf32>
    %145 = vector.shape_cast %144 : vector<2x1x32xf32> to vector<2x32xf32>
    %146 = vector.broadcast %143 : f32 to vector<2x32xf32>
    %147 = arith.mulf %146, %145 : vector<2x32xf32>
    %148 = arith.addf %142, %147 : vector<2x32xf32>
    %c25 = arith.constant 25 : index
    %149 = memref.load %arg1[%c25] : memref<36xf32, #tpu.memory_space<smem>>
    %c0_75 = arith.constant 0 : index
    %c25_76 = arith.constant 25 : index
    %c0_77 = arith.constant 0 : index
    %150 = vector.load %arg2[%c0_75, %c25_76, %c0_77] : memref<2x36x32xf32, #tpu.memory_space<vmem>>, vector<2x1x32xf32>
    %151 = vector.shape_cast %150 : vector<2x1x32xf32> to vector<2x32xf32>
    %152 = vector.broadcast %149 : f32 to vector<2x32xf32>
    %153 = arith.mulf %152, %151 : vector<2x32xf32>
    %154 = arith.addf %148, %153 : vector<2x32xf32>
    %c26 = arith.constant 26 : index
    %155 = memref.load %arg1[%c26] : memref<36xf32, #tpu.memory_space<smem>>
    %c0_78 = arith.constant 0 : index
    %c26_79 = arith.constant 26 : index
    %c0_80 = arith.constant 0 : index
    %156 = vector.load %arg2[%c0_78, %c26_79, %c0_80] : memref<2x36x32xf32, #tpu.memory_space<vmem>>, vector<2x1x32xf32>
    %157 = vector.shape_cast %156 : vector<2x1x32xf32> to vector<2x32xf32>
    %158 = vector.broadcast %155 : f32 to vector<2x32xf32>
    %159 = arith.mulf %158, %157 : vector<2x32xf32>
    %160 = arith.addf %154, %159 : vector<2x32xf32>
    %c27 = arith.constant 27 : index
    %161 = memref.load %arg1[%c27] : memref<36xf32, #tpu.memory_space<smem>>
    %c0_81 = arith.constant 0 : index
    %c27_82 = arith.constant 27 : index
    %c0_83 = arith.constant 0 : index
    %162 = vector.load %arg2[%c0_81, %c27_82, %c0_83] : memref<2x36x32xf32, #tpu.memory_space<vmem>>, vector<2x1x32xf32>
    %163 = vector.shape_cast %162 : vector<2x1x32xf32> to vector<2x32xf32>
    %164 = vector.broadcast %161 : f32 to vector<2x32xf32>
    %165 = arith.mulf %164, %163 : vector<2x32xf32>
    %166 = arith.addf %160, %165 : vector<2x32xf32>
    %c28 = arith.constant 28 : index
    %167 = memref.load %arg1[%c28] : memref<36xf32, #tpu.memory_space<smem>>
    %c0_84 = arith.constant 0 : index
    %c28_85 = arith.constant 28 : index
    %c0_86 = arith.constant 0 : index
    %168 = vector.load %arg2[%c0_84, %c28_85, %c0_86] : memref<2x36x32xf32, #tpu.memory_space<vmem>>, vector<2x1x32xf32>
    %169 = vector.shape_cast %168 : vector<2x1x32xf32> to vector<2x32xf32>
    %170 = vector.broadcast %167 : f32 to vector<2x32xf32>
    %171 = arith.mulf %170, %169 : vector<2x32xf32>
    %172 = arith.addf %166, %171 : vector<2x32xf32>
    %c29 = arith.constant 29 : index
    %173 = memref.load %arg1[%c29] : memref<36xf32, #tpu.memory_space<smem>>
    %c0_87 = arith.constant 0 : index
    %c29_88 = arith.constant 29 : index
    %c0_89 = arith.constant 0 : index
    %174 = vector.load %arg2[%c0_87, %c29_88, %c0_89] : memref<2x36x32xf32, #tpu.memory_space<vmem>>, vector<2x1x32xf32>
    %175 = vector.shape_cast %174 : vector<2x1x32xf32> to vector<2x32xf32>
    %176 = vector.broadcast %173 : f32 to vector<2x32xf32>
    %177 = arith.mulf %176, %175 : vector<2x32xf32>
    %178 = arith.addf %172, %177 : vector<2x32xf32>
    %c30 = arith.constant 30 : index
    %179 = memref.load %arg1[%c30] : memref<36xf32, #tpu.memory_space<smem>>
    %c0_90 = arith.constant 0 : index
    %c30_91 = arith.constant 30 : index
    %c0_92 = arith.constant 0 : index
    %180 = vector.load %arg2[%c0_90, %c30_91, %c0_92] : memref<2x36x32xf32, #tpu.memory_space<vmem>>, vector<2x1x32xf32>
    %181 = vector.shape_cast %180 : vector<2x1x32xf32> to vector<2x32xf32>
    %182 = vector.broadcast %179 : f32 to vector<2x32xf32>
    %183 = arith.mulf %182, %181 : vector<2x32xf32>
    %184 = arith.addf %178, %183 : vector<2x32xf32>
    %c31 = arith.constant 31 : index
    %185 = memref.load %arg1[%c31] : memref<36xf32, #tpu.memory_space<smem>>
    %c0_93 = arith.constant 0 : index
    %c31_94 = arith.constant 31 : index
    %c0_95 = arith.constant 0 : index
    %186 = vector.load %arg2[%c0_93, %c31_94, %c0_95] : memref<2x36x32xf32, #tpu.memory_space<vmem>>, vector<2x1x32xf32>
    %187 = vector.shape_cast %186 : vector<2x1x32xf32> to vector<2x32xf32>
    %188 = vector.broadcast %185 : f32 to vector<2x32xf32>
    %189 = arith.mulf %188, %187 : vector<2x32xf32>
    %190 = arith.addf %184, %189 : vector<2x32xf32>
    %c32 = arith.constant 32 : index
    %191 = memref.load %arg1[%c32] : memref<36xf32, #tpu.memory_space<smem>>
    %c0_96 = arith.constant 0 : index
    %c32_97 = arith.constant 32 : index
    %c0_98 = arith.constant 0 : index
    %192 = vector.load %arg2[%c0_96, %c32_97, %c0_98] : memref<2x36x32xf32, #tpu.memory_space<vmem>>, vector<2x1x32xf32>
    %193 = vector.shape_cast %192 : vector<2x1x32xf32> to vector<2x32xf32>
    %194 = vector.broadcast %191 : f32 to vector<2x32xf32>
    %195 = arith.mulf %194, %193 : vector<2x32xf32>
    %196 = arith.addf %190, %195 : vector<2x32xf32>
    %c33 = arith.constant 33 : index
    %197 = memref.load %arg1[%c33] : memref<36xf32, #tpu.memory_space<smem>>
    %c0_99 = arith.constant 0 : index
    %c33_100 = arith.constant 33 : index
    %c0_101 = arith.constant 0 : index
    %198 = vector.load %arg2[%c0_99, %c33_100, %c0_101] : memref<2x36x32xf32, #tpu.memory_space<vmem>>, vector<2x1x32xf32>
    %199 = vector.shape_cast %198 : vector<2x1x32xf32> to vector<2x32xf32>
    %200 = vector.broadcast %197 : f32 to vector<2x32xf32>
    %201 = arith.mulf %200, %199 : vector<2x32xf32>
    %202 = arith.addf %196, %201 : vector<2x32xf32>
    %c34 = arith.constant 34 : index
    %203 = memref.load %arg1[%c34] : memref<36xf32, #tpu.memory_space<smem>>
    %c0_102 = arith.constant 0 : index
    %c34_103 = arith.constant 34 : index
    %c0_104 = arith.constant 0 : index
    %204 = vector.load %arg2[%c0_102, %c34_103, %c0_104] : memref<2x36x32xf32, #tpu.memory_space<vmem>>, vector<2x1x32xf32>
    %205 = vector.shape_cast %204 : vector<2x1x32xf32> to vector<2x32xf32>
    %206 = vector.broadcast %203 : f32 to vector<2x32xf32>
    %207 = arith.mulf %206, %205 : vector<2x32xf32>
    %208 = arith.addf %202, %207 : vector<2x32xf32>
    %c35 = arith.constant 35 : index
    %209 = memref.load %arg1[%c35] : memref<36xf32, #tpu.memory_space<smem>>
    %c0_105 = arith.constant 0 : index
    %c35_106 = arith.constant 35 : index
    %c0_107 = arith.constant 0 : index
    %210 = vector.load %arg2[%c0_105, %c35_106, %c0_107] : memref<2x36x32xf32, #tpu.memory_space<vmem>>, vector<2x1x32xf32>
    %211 = vector.shape_cast %210 : vector<2x1x32xf32> to vector<2x32xf32>
    %212 = vector.broadcast %209 : f32 to vector<2x32xf32>
    %213 = arith.mulf %212, %211 : vector<2x32xf32>
    %214 = arith.addf %208, %213 : vector<2x32xf32>
    %c0_108 = arith.constant 0 : index
    %c0_109 = arith.constant 0 : index
    %215 = vector.load %arg3[%c0_108, %c0_109] : memref<32x128xf32, #tpu.memory_space<vmem>>, vector<32x128xf32>
    %cst = arith.constant dense<0.000000e+00> : vector<2x128xf32>
    %216 = tpu.matmul %214, %215, %cst {dimension_numbers = #tpu.dot_dimension_numbers<[1], [0], [0], [1], [0, 0, 1, 1], [], []>} : vector<2x32xf32>, vector<32x128xf32>, vector<2x128xf32> -> vector<2x128xf32>
    %c0_110 = arith.constant 0 : index
    %c0_111 = arith.constant 0 : index
    %217 = vector.load %arg4[%c0_110, %c0_111] : memref<1x128xf32, #tpu.memory_space<vmem>>, vector<1x128xf32>
    %218 = vector.broadcast %217 : vector<1x128xf32> to vector<2x128xf32>
    %219 = arith.addf %216, %218 : vector<2x128xf32>
    %220 = arith.mulf %219, %219 : vector<2x128xf32>
    %cst_112 = arith.constant dense<0.000000e+00> : vector<2xf32>
    %221 = vector.multi_reduction <add>, %220, %cst_112 [1] : vector<2x128xf32> to vector<2xf32>
    %222 = vector.shape_cast %221 : vector<2xf32> to vector<2x1xf32>
    %223 = math.sqrt %222 : vector<2x1xf32>
    %cst_113 = arith.constant 9.99999993E-9 : f32
    %224 = vector.broadcast %cst_113 : f32 to vector<2x1xf32>
    %225 = arith.addf %223, %224 : vector<2x1xf32>
    %226 = tpu.reciprocal %225 {approx = true} : vector<2x1xf32> -> vector<2x1xf32>
    %227 = vector.broadcast %226 : vector<2x1xf32> to vector<2x128xf32>
    %228 = arith.mulf %219, %227 : vector<2x128xf32>
    %c0_114 = arith.constant 0 : index
    %c0_115 = arith.constant 0 : index
    %229 = vector.load %arg5[%c0_114, %c0_115] : memref<2x128xf32, #tpu.memory_space<vmem>>, vector<2x128xf32>
    tpu.vector_store %arg5[%c0_114, %c0_115], %228 {strides = array<i32>} : memref<2x128xf32, #tpu.memory_space<vmem>>, vector<2x128xf32>,
    return
  }
  func.func @transform_0(%arg0: i32) -> i32 {
    %c0_i32 = arith.constant 0 : i32
    %c0_i32_0 = arith.constant 0 : i32
    return %c0_i32 : i32
  }
  func.func @transform_1(%arg0: i32) -> (i32, i32, i32) {
    %c0_i32 = arith.constant 0 : i32
    %c0_i32_0 = arith.constant 0 : i32
    %c0_i32_1 = arith.constant 0 : i32
    return %arg0, %c0_i32, %c0_i32_0 : i32, i32, i32
  }
  func.func @transform_2(%arg0: i32) -> (i32, i32) {
    %c0_i32 = arith.constant 0 : i32
    %c0_i32_0 = arith.constant 0 : i32
    %c0_i32_1 = arith.constant 0 : i32
    return %c0_i32, %c0_i32_0 : i32, i32
  }
  func.func @transform_3(%arg0: i32) -> (i32, i32) {
    %c0_i32 = arith.constant 0 : i32
    %c0_i32_0 = arith.constant 0 : i32
    %c0_i32_1 = arith.constant 0 : i32
    return %c0_i32, %c0_i32_0 : i32, i32
  }
  func.func @transform_4(%arg0: i32) -> (i32, i32) {
    %c0_i32 = arith.constant 0 : i32
    %c0_i32_0 = arith.constant 0 : i32
    return %arg0, %c0_i32 : i32, i32
  }
}

</mosaic_0001>

<bundles_post_ra>
// kernel: tpu_custom_call.1
= control target key start
LH: loop header
LB: loop body
LE: loop exit
PB: predicated region body
PF: predicated region fallthrough
CT: control target
= control target key end

     0   :  { %9 = vsyncpa [#allocation4], 0  ;;  %s915_s0 = inlined_call_operand.vmem [shape: f32[36], index: 0, kind: input, shape index: {}]   ;;  %s916_s1 = inlined_call_operand.vmem [shape: f32[2,36,32], index: 1, kind: input, shape index: {}]   ;;  %s917_s2 = inlined_call_operand.vmem [shape: f32[32,128], index: 2, kind: input, shape index: {}]   ;;  %s918_s3 = inlined_call_operand.vmem [shape: f32[1,128], index: 3, kind: input, shape index: {}]   ;;  %s919_s4 = inlined_call_operand.hbm [shape: f32[2,128], index: 4, kind: output, shape index: {}]  }
   0x1   :  { %10 = vsyncpa [#allocation3], 0  ;;  %s17_s17 = sshll.u32 %s915_s0, 4  ;;  %s18_s17 = int_to_ptr.vmem [resolvable:$true] %s17_s17 }
   0x2   :  { %s505_s18 = scalar_lea.vmem %s18_s17, 16  ;;  %p510_p1 = scmp.lt.s32.totalorder %s18_s17, %s18_s17 }
   0x3   :  { %p506_p0 = scmp.ne.s32.totalorder %s18_s17, %s505_s18  ;;  %p511_p2 = scmp.lt.s32.totalorder %s505_s18, %s505_s18 }
   0x5   :  { %p512_p3 = por %p511_p2, %p510_p1 }
   0x7   :  { %p513_p4 = pnand %p512_p3, %p506_p0 }
   0x9   :  { %516 = shalt.err (!%p513_p4)
}
   0xa   :  { %s543_s19 = smov [#allocation2]  }
   0xb   :  { %20 = dma.vmem_to_smem %s18_s17, 16, %s543_s19, [#allocation4]  }
   0xc   :  { %539 = dma.done.wait [#allocation4], 16  }
   0xd   :  { %540 = vsyncadd [#allocation4], 4294967280 }
   0xe   :  { %30 = sfence }
   0xf   :  { %v317_v0 = vld [vmem:[%s917_s2] sm:$0xff]  ;;  %v318_v1 = vld [vmem:[%s917_s2 + $0x8] sm:$0xff]  ;;  %v319_v2 = vld [vmem:[%s917_s2 + $0x10] sm:$0xff]  ;;  %v544_v3 = vmov 0.0|0.0   ;;  %vm545_vm0 = vmmov 0   ;;  %v546_v6 = vmov 0.0  }
  0x10   :  { %490 = vmatprep.subr.bf16.mxu0 %v544_v3  ;;  %v491_v4 = vpack.c.bf16 %v318_v1, %v317_v0  ;;  %v320_v5 = vld [vmem:[%s917_s2 + $0x18] sm:$0xff]  ;;  %487 = vmatprep.mubr.msk.f32.mxu0 %vm545_vm0, %v546_v6  ;;  %s31_s27 = sld [smem:[#allocation2]]  ;;  %s437_s28 = sld [smem:[#allocation2 + $0x1]]  ;;  %v32_v8 = vld [vmem:[%s916_s1] sm:$0x1]  ;;  %vm331_vm1 = vcmask 1041409  }
  0x11   :  { %v494_v7 = vpack.c.bf16 %v320_v5, %v319_v2  ;;  %s438_s29 = sld [smem:[#allocation2 + $0x2]]  ;;  %s439_s30 = sld [smem:[#allocation2 + $0x3]]  ;;  %v33_v9 = vld [vmem:[%s916_s1 + $0x28] sm:$0x1]  ;;  %v38_v10 = vld [vmem:[%s916_s1 + $0x1] sm:$0x1] }
  0x12   :  { %492 = vmatpush3.bf16.msra.mxu0 %v491_v4  ;;  %s594_s9 = sld [smem:[#allocation2 + $0x4]]  ;;  %v39_v11 = vld [vmem:[%s916_s1 + $0x29] sm:$0x1]  ;;  %s602_s13 = sld [smem:[#allocation2 + $0x5]]  ;;  %v46_v13 = vld [vmem:[%s916_s1 + $0x2] sm:$0x1] }
  0x13   :  { %493 = vmatprep.subr.bf16.mxu0 %v544_v3  ;;  %v47_v14 = vld [vmem:[%s916_s1 + $0x2a] sm:$0x1]  ;;  %s610_s18 = sld [smem:[#allocation2 + $0x6]]  ;;  %v54_v18 = vld [vmem:[%s916_s1 + $0x3] sm:$0x1]  ;;  %s618_s23 = sld [smem:[#allocation2 + $0x7]] }
  0x14   :  { %v55_v19 = vld [vmem:[%s916_s1 + $0x2b] sm:$0x1]  ;;  %v62_v26 = vld [vmem:[%s916_s1 + $0x4] sm:$0x1]  ;;  %v63_v27 = vld [vmem:[%s916_s1 + $0x2c] sm:$0x1] }
  0x15   :  { %v70_v33 = vld [vmem:[%s916_s1 + $0x5] sm:$0x1]  ;;  %v71_v34 = vld [vmem:[%s916_s1 + $0x2d] sm:$0x1]  ;;  %s636_s6 = sld [smem:[#allocation2 + $0x9]]  ;;  %s645_s10 = sld [smem:[#allocation2 + $0xa]] }
  0x16   :  { %495 = vmatpush3.bf16.msra.mxu0 %v494_v7  ;;  %v34_v12 = vstv %s31_s27  ;;  %v40_v17 = vstv %s437_s28  ;;  %s626_s27 = sld [smem:[#allocation2 + $0x8]]  ;;  %v78_v40 = vld [vmem:[%s916_s1 + $0x6] sm:$0x1]  ;;  %v79_v41 = vld [vmem:[%s916_s1 + $0x2e] sm:$0x1]  ;;  %s654_s15 = sld [smem:[#allocation2 + $0xb]] }
  0x17   :  { %v35_v15 = vmul.f32 %v34_v12, %v32_v8  ;;  %v36_v16 = vmul.f32 %v34_v12, %v33_v9  ;;  %v41_v20 = vmul.f32 %v40_v17, %v38_v10  ;;  %v42_v21 = vmul.f32 %v40_v17, %v39_v11  ;;  %v86_v47 = vld [vmem:[%s916_s1 + $0x7] sm:$0x1]  ;;  %v87_v48 = vld [vmem:[%s916_s1 + $0x2f] sm:$0x1]  ;;  %v94_v54 = vld [vmem:[%s916_s1 + $0x8] sm:$0x1] }
  0x18   :  { %v48_v22 = vstv %s438_s29  ;;  %v56_v25 = vstv %s439_s30  ;;  %v64_v32 = vstv %s594_s9  ;;  %v72_v35 = vstv %s602_s13  ;;  %s663_s20 = sld [smem:[#allocation2 + $0xc]]  ;;  %s672_s24 = sld [smem:[#allocation2 + $0xd]] }
  0x19   :  { %v49_v23 = vmul.f32 %v48_v22, %v46_v13  ;;  %v50_v24 = vmul.f32 %v48_v22, %v47_v14  ;;  %v43_v28 = vadd.f32 %v41_v20, %v35_v15  ;;  %v44_v29 = vadd.f32 %v42_v21, %v36_v16  ;;  %v95_v55 = vld [vmem:[%s916_s1 + $0x30] sm:$0x1]  ;;  %v102_v61 = vld [vmem:[%s916_s1 + $0x9] sm:$0x1]  ;;  %v103_v62 = vld [vmem:[%s916_s1 + $0x31] sm:$0x1] }
  0x1a   :  { %v57_v30 = vmul.f32 %v56_v25, %v54_v18  ;;  %v58_v31 = vmul.f32 %v56_v25, %v55_v19  ;;  %v65_v38 = vmul.f32 %v64_v32, %v62_v26  ;;  %v66_v39 = vmul.f32 %v64_v32, %v63_v27  ;;  %v110_v4 = vld [vmem:[%s916_s1 + $0xa] sm:$0x1]  ;;  %v111_v5 = vld [vmem:[%s916_s1 + $0x32] sm:$0x1]  ;;  %s681_s29 = sld [smem:[#allocation2 + $0xe]]  ;;  %s690_s8 = sld [smem:[#allocation2 + $0xf]] }
  0x1b   :  { %v51_v36 = vadd.f32 %v49_v23, %v43_v28  ;;  %v52_v37 = vadd.f32 %v50_v24, %v44_v29  ;;  %v80_v42 = vstv %s610_s18  ;;  %v73_v45 = vmul.f32 %v72_v35, %v70_v33  ;;  %v118_v11 = vld [vmem:[%s916_s1 + $0xb] sm:$0x1]  ;;  %v119_v12 = vld [vmem:[%s916_s1 + $0x33] sm:$0x1]  ;;  %v126_v18 = vld [vmem:[%s916_s1 + $0xc] sm:$0x1] }
  0x1c   :  { %v74_v46 = vmul.f32 %v72_v35, %v71_v34  ;;  %v88_v49 = vstv %s618_s23  ;;  %v81_v52 = vmul.f32 %v80_v42, %v78_v40  ;;  %v82_v53 = vmul.f32 %v80_v42, %v79_v41  ;;  %v127_v19 = vld [vmem:[%s916_s1 + $0x34] sm:$0x1]  ;;  %s699_s12 = sld [smem:[#allocation2 + $0x10]]  ;;  %v134_v25 = vld [vmem:[%s916_s1 + $0xd] sm:$0x1]  ;;  %s708_s17 = sld [smem:[#allocation2 + $0x11]] }
  0x1d   :  { %v59_v43 = vadd.f32 %v57_v30, %v51_v36  ;;  %v60_v44 = vadd.f32 %v58_v31, %v52_v37  ;;  %v96_v56 = vstv %s626_s27  ;;  %v89_v59 = vmul.f32 %v88_v49, %v86_v47  ;;  %v135_v26 = vld [vmem:[%s916_s1 + $0x35] sm:$0x1]  ;;  %v142_v32 = vld [vmem:[%s916_s1 + $0xe] sm:$0x1]  ;;  %v143_v33 = vld [vmem:[%s916_s1 + $0x36] sm:$0x1] }
  0x1e   :  { %v90_v60 = vmul.f32 %v88_v49, %v87_v48  ;;  %v104_v63 = vstv %s636_s6  ;;  %v97_v2 = vmul.f32 %v96_v56, %v94_v54  ;;  %v98_v3 = vmul.f32 %v96_v56, %v95_v55  ;;  %s717_s22 = sld [smem:[#allocation2 + $0x12]]  ;;  %v151_v40 = vld [vmem:[%s916_s1 + $0x37] sm:$0x1]  ;;  %s726_s26 = sld [smem:[#allocation2 + $0x13]]  ;;  %v159_v47 = vld [vmem:[%s916_s1 + $0x38] sm:$0x1] }
  0x1f   :  { %v67_v50 = vadd.f32 %v65_v38, %v59_v43  ;;  %v68_v51 = vadd.f32 %v66_v39, %v60_v44  ;;  %v112_v6 = vstv %s645_s10  ;;  %v105_v9 = vmul.f32 %v104_v63, %v102_v61  ;;  %v150_v39 = vld [vmem:[%s916_s1 + $0xf] sm:$0x1]  ;;  %s735_s5 = sld [smem:[#allocation2 + $0x14]]  ;;  %v167_v54 = vld [vmem:[%s916_s1 + $0x39] sm:$0x1]  ;;  %s744_s2 = sld [smem:[#allocation2 + $0x15]] }
  0x20   :  { %v106_v10 = vmul.f32 %v104_v63, %v103_v62  ;;  %v120_v13 = vstv %s654_s15  ;;  %v113_v16 = vmul.f32 %v112_v6, %v110_v4  ;;  %v114_v17 = vmul.f32 %v112_v6, %v111_v5  ;;  %v175_v61 = vld [vmem:[%s916_s1 + $0x3a] sm:$0x1]  ;;  %s753_s14 = sld [smem:[#allocation2 + $0x16]]  ;;  %v183_v4 = vld [vmem:[%s916_s1 + $0x3b] sm:$0x1]  ;;  %s762_s19 = sld [smem:[#allocation2 + $0x17]] }
  0x21   :  { %v75_v57 = vadd.f32 %v73_v45, %v67_v50  ;;  %v76_v58 = vadd.f32 %v74_v46, %v68_v51  ;;  %v128_v20 = vstv %s663_s20  ;;  %v121_v23 = vmul.f32 %v120_v13, %v118_v11  ;;  %v158_v46 = vld [vmem:[%s916_s1 + $0x10] sm:$0x1]  ;;  %v191_v11 = vld [vmem:[%s916_s1 + $0x3c] sm:$0x1]  ;;  %s771_s0 = sld [smem:[#allocation2 + $0x18]]  ;;  %s780_s28 = sld [smem:[#allocation2 + $0x19]] }
  0x22   :  { %v122_v24 = vmul.f32 %v120_v13, %v119_v12  ;;  %v136_v27 = vstv %s672_s24  ;;  %v129_v30 = vmul.f32 %v128_v20, %v126_v18  ;;  %v130_v31 = vmul.f32 %v128_v20, %v127_v19  ;;  %v199_v18 = vld [vmem:[%s916_s1 + $0x3d] sm:$0x1]  ;;  %s789_s7 = sld [smem:[#allocation2 + $0x1a]]  ;;  %s798_s11 = sld [smem:[#allocation2 + $0x1b]] }
  0x23   :  { %v83_v0 = vadd.f32 %v81_v52, %v75_v57  ;;  %v84_v1 = vadd.f32 %v82_v53, %v76_v58  ;;  %v144_v34 = vstv %s681_s29  ;;  %v137_v37 = vmul.f32 %v136_v27, %v134_v25  ;;  %v166_v53 = vld [vmem:[%s916_s1 + $0x11] sm:$0x1]  ;;  %v207_v25 = vld [vmem:[%s916_s1 + $0x3e] sm:$0x1]  ;;  %s807_s16 = sld [smem:[#allocation2 + $0x1c]]  ;;  %s816_s21 = sld [smem:[#allocation2 + $0x1d]] }
  0x24   :  { %v138_v38 = vmul.f32 %v136_v27, %v135_v26  ;;  %v152_v41 = vstv %s690_s8  ;;  %v145_v44 = vmul.f32 %v144_v34, %v142_v32  ;;  %v146_v45 = vmul.f32 %v144_v34, %v143_v33  ;;  %v215_v32 = vld [vmem:[%s916_s1 + $0x3f] sm:$0x1]  ;;  %s825_s25 = sld [smem:[#allocation2 + $0x1e]]  ;;  %s834_s30 = sld [smem:[#allocation2 + $0x1f]] }
  0x25   :  { %v91_v7 = vadd.f32 %v89_v59, %v83_v0  ;;  %v92_v8 = vadd.f32 %v90_v60, %v84_v1  ;;  %v160_v48 = vstv %s699_s12  ;;  %v153_v51 = vmul.f32 %v152_v41, %v150_v39  ;;  %v174_v60 = vld [vmem:[%s916_s1 + $0x12] sm:$0x1]  ;;  %v223_v39 = vld [vmem:[%s916_s1 + $0x40] sm:$0x1]  ;;  %s843_s9 = sld [smem:[#allocation2 + $0x20]]  ;;  %s852_s13 = sld [smem:[#allocation2 + $0x21]] }
  0x26   :  { %v154_v52 = vmul.f32 %v152_v41, %v151_v40  ;;  %v168_v55 = vstv %s708_s17  ;;  %v161_v58 = vmul.f32 %v160_v48, %v158_v46  ;;  %v162_v59 = vmul.f32 %v160_v48, %v159_v47  ;;  %v231_v46 = vld [vmem:[%s916_s1 + $0x41] sm:$0x1]  ;;  %s861_s18 = sld [smem:[#allocation2 + $0x22]]  ;;  %s870_s23 = sld [smem:[#allocation2 + $0x23]] }
  0x27   :  { %v99_v14 = vadd.f32 %v97_v2, %v91_v7  ;;  %v100_v15 = vadd.f32 %v98_v3, %v92_v8  ;;  %v176_v62 = vstv %s717_s22  ;;  %v169_v1 = vmul.f32 %v168_v55, %v166_v53  ;;  %v182_v3 = vld [vmem:[%s916_s1 + $0x13] sm:$0x1]  ;;  %v239_v53 = vld [vmem:[%s916_s1 + $0x42] sm:$0x1] }
  0x28   :  { %v170_v2 = vmul.f32 %v168_v55, %v167_v54  ;;  %v184_v5 = vstv %s726_s26  ;;  %v177_v8 = vmul.f32 %v176_v62, %v174_v60  ;;  %v192_v12 = vstv %s735_s5  ;;  %v247_v60 = vld [vmem:[%s916_s1 + $0x43] sm:$0x1] }
  0x29   :  { %v107_v21 = vadd.f32 %v105_v9, %v99_v14  ;;  %v108_v22 = vadd.f32 %v106_v10, %v100_v15  ;;  %v178_v9 = vmul.f32 %v176_v62, %v175_v61  ;;  %v190_v10 = vld [vmem:[%s916_s1 + $0x14] sm:$0x1]  ;;  %v185_v15 = vmul.f32 %v184_v5, %v182_v3  ;;  %v255_v3 = vld [vmem:[%s916_s1 + $0x44] sm:$0x1] }
  0x2a   :  { %v200_v19 = vstv %s744_s2  ;;  %v208_v26 = vstv %s753_s14  ;;  %v216_v33 = vstv %s762_s19  ;;  %v224_v40 = vstv %s771_s0 }
  0x2b   :  { %v115_v28 = vadd.f32 %v113_v16, %v107_v21  ;;  %v116_v29 = vadd.f32 %v114_v17, %v108_v22  ;;  %v186_v16 = vmul.f32 %v184_v5, %v183_v4  ;;  %v198_v17 = vld [vmem:[%s916_s1 + $0x15] sm:$0x1]  ;;  %v193_v22 = vmul.f32 %v192_v12, %v190_v10  ;;  %v263_v10 = vld [vmem:[%s916_s1 + $0x45] sm:$0x1] }
  0x2c   :  { %v232_v47 = vstv %s780_s28  ;;  %v240_v54 = vstv %s789_s7  ;;  %v248_v61 = vstv %s798_s11  ;;  %v256_v4 = vstv %s807_s16 }
  0x2d   :  { %v123_v35 = vadd.f32 %v121_v23, %v115_v28  ;;  %v124_v36 = vadd.f32 %v122_v24, %v116_v29  ;;  %v194_v23 = vmul.f32 %v192_v12, %v191_v11  ;;  %v206_v24 = vld [vmem:[%s916_s1 + $0x16] sm:$0x1]  ;;  %v201_v29 = vmul.f32 %v200_v19, %v198_v17  ;;  %v271_v17 = vld [vmem:[%s916_s1 + $0x46] sm:$0x1] }
  0x2e   :  { %v264_v11 = vstv %s816_s21  ;;  %vm333_vm2 = vcmask 261120   ;;  %vm407_vm3 = vcmask 1041408  }
  0x2f   :  { %v131_v42 = vadd.f32 %v129_v30, %v123_v35  ;;  %v132_v43 = vadd.f32 %v130_v31, %v124_v36  ;;  %v202_v30 = vmul.f32 %v200_v19, %v199_v18  ;;  %v214_v31 = vld [vmem:[%s916_s1 + $0x17] sm:$0x1]  ;;  %v209_v36 = vmul.f32 %v208_v26, %v206_v24  ;;  %v279_v24 = vld [vmem:[%s916_s1 + $0x47] sm:$0x1] }
  0x30   :  { %v272_v18 = vstv %s825_s25 }
  0x31   :  { %v139_v49 = vadd.f32 %v137_v37, %v131_v42  ;;  %v140_v50 = vadd.f32 %v138_v38, %v132_v43  ;;  %v210_v37 = vmul.f32 %v208_v26, %v207_v25  ;;  %v222_v38 = vld [vmem:[%s916_s1 + $0x18] sm:$0x1]  ;;  %v217_v43 = vmul.f32 %v216_v33, %v214_v31  ;;  %v287_v31 = vld [vmem:[%s916_s1 + $0x48] sm:$0x1] }
  0x32   :  { %v280_v25 = vstv %s834_s30 }
  0x33   :  { %v147_v56 = vadd.f32 %v145_v44, %v139_v49  ;;  %v148_v57 = vadd.f32 %v146_v45, %v140_v50  ;;  %v218_v44 = vmul.f32 %v216_v33, %v215_v32  ;;  %v230_v45 = vld [vmem:[%s916_s1 + $0x19] sm:$0x1]  ;;  %v225_v50 = vmul.f32 %v224_v40, %v222_v38  ;;  %v295_v38 = vld [vmem:[%s916_s1 + $0x49] sm:$0x1] }
  0x34   :  { %v288_v32 = vstv %s843_s9 }
  0x35   :  { %v155_v63 = vadd.f32 %v153_v51, %v147_v56  ;;  %v156_v0 = vadd.f32 %v154_v52, %v148_v57  ;;  %v226_v51 = vmul.f32 %v224_v40, %v223_v39  ;;  %v238_v52 = vld [vmem:[%s916_s1 + $0x1a] sm:$0x1]  ;;  %v233_v57 = vmul.f32 %v232_v47, %v230_v45  ;;  %v303_v45 = vld [vmem:[%s916_s1 + $0x4a] sm:$0x1] }
  0x36   :  { %v296_v39 = vstv %s852_s13  ;;  %s547_s13 = smov [#allocation5]  }
  0x37   :  { %v163_v6 = vadd.f32 %v161_v58, %v155_v63  ;;  %v164_v7 = vadd.f32 %v162_v59, %v156_v0  ;;  %v234_v58 = vmul.f32 %v232_v47, %v231_v46  ;;  %v246_v59 = vld [vmem:[%s916_s1 + $0x1b] sm:$0x1]  ;;  %v241_v0 = vmul.f32 %v240_v54, %v238_v52  ;;  %v311_v52 = vld [vmem:[%s916_s1 + $0x4b] sm:$0x1] }
  0x38   :  { %v304_v46 = vstv %s861_s18 }
  0x39   :  { %v171_v13 = vadd.f32 %v169_v1, %v163_v6  ;;  %v172_v14 = vadd.f32 %v170_v2, %v164_v7  ;;  %v242_v1 = vmul.f32 %v240_v54, %v239_v53  ;;  %v254_v2 = vld [vmem:[%s916_s1 + $0x1c] sm:$0x1]  ;;  %v249_v7 = vmul.f32 %v248_v61, %v246_v59 }
  0x3a   :  { %v312_v53 = vstv %s870_s23 }
  0x3b   :  { %v179_v20 = vadd.f32 %v177_v8, %v171_v13  ;;  %v180_v21 = vadd.f32 %v178_v9, %v172_v14  ;;  %v250_v8 = vmul.f32 %v248_v61, %v247_v60  ;;  %v262_v9 = vld [vmem:[%s916_s1 + $0x1d] sm:$0x1]  ;;  %v257_v14 = vmul.f32 %v256_v4, %v254_v2 }
  0x3c   :  { %v314_v61 = vmul.f32 %v312_v53, %v311_v52 }
  0x3d   :  { %v187_v27 = vadd.f32 %v185_v15, %v179_v20  ;;  %v188_v28 = vadd.f32 %v186_v16, %v180_v21  ;;  %v258_v15 = vmul.f32 %v256_v4, %v255_v3  ;;  %v270_v16 = vld [vmem:[%s916_s1 + $0x1e] sm:$0x1]  ;;  %v265_v21 = vmul.f32 %v264_v11, %v262_v9  ;;  %v472_v4 = vld [vmem:[%s918_s3] ss:$0 sm:$0xff]  ;;  %s428_s3 = sshll.u32 %s547_s13, 4  ;;  %s429_s3 = int_to_ptr.vmem [resolvable:$true] %s428_s3 }
  0x3e   :  { %s517_s14 = scalar_lea.vmem %s429_s3, 32  ;;  %p522_p6 = scmp.lt.s32.totalorder %s429_s3, %s429_s3 }
  0x3f   :  { %v195_v34 = vadd.f32 %v193_v22, %v187_v27  ;;  %v196_v35 = vadd.f32 %v194_v23, %v188_v28  ;;  %v266_v22 = vmul.f32 %v264_v11, %v263_v10  ;;  %v278_v23 = vld [vmem:[%s916_s1 + $0x1f] sm:$0x1]  ;;  %v273_v28 = vmul.f32 %v272_v18, %v270_v16  ;;  %p518_p5 = scmp.ne.s32.totalorder %s429_s3, %s517_s14  ;;  %p523_p7 = scmp.lt.s32.totalorder %s517_s14, %s517_s14 }
  0x41   :  { %v203_v41 = vadd.f32 %v201_v29, %v195_v34  ;;  %v204_v42 = vadd.f32 %v202_v30, %v196_v35  ;;  %v274_v29 = vmul.f32 %v272_v18, %v271_v17  ;;  %v286_v30 = vld [vmem:[%s916_s1 + $0x20] sm:$0x1]  ;;  %v281_v35 = vmul.f32 %v280_v25, %v278_v23  ;;  %p524_p8 = por %p523_p7, %p522_p6 }
  0x43   :  { %v211_v48 = vadd.f32 %v209_v36, %v203_v41  ;;  %v212_v49 = vadd.f32 %v210_v37, %v204_v42  ;;  %v282_v36 = vmul.f32 %v280_v25, %v279_v24  ;;  %v294_v37 = vld [vmem:[%s916_s1 + $0x21] sm:$0x1]  ;;  %v289_v42 = vmul.f32 %v288_v32, %v286_v30  ;;  %p525_p9 = pnand %p524_p8, %p518_p5 }
  0x45   :  { %v219_v55 = vadd.f32 %v217_v43, %v211_v48  ;;  %v220_v56 = vadd.f32 %v218_v44, %v212_v49  ;;  %v290_v43 = vmul.f32 %v288_v32, %v287_v31  ;;  %v302_v44 = vld [vmem:[%s916_s1 + $0x22] sm:$0x1]  ;;  %v297_v49 = vmul.f32 %v296_v39, %v294_v37 }
  0x47   :  { %v227_v62 = vadd.f32 %v225_v50, %v219_v55  ;;  %v228_v63 = vadd.f32 %v226_v51, %v220_v56  ;;  %v298_v50 = vmul.f32 %v296_v39, %v295_v38  ;;  %v310_v51 = vld [vmem:[%s916_s1 + $0x23] sm:$0x1]  ;;  %v305_v56 = vmul.f32 %v304_v46, %v302_v44 }
  0x48   :  { %v313_v60 = vmul.f32 %v312_v53, %v310_v51 }
  0x49   :  { %v235_v5 = vadd.f32 %v233_v57, %v227_v62  ;;  %v236_v6 = vadd.f32 %v234_v58, %v228_v63  ;;  %v306_v57 = vmul.f32 %v304_v46, %v303_v45 }
  0x4b   :  { %v243_v12 = vadd.f32 %v241_v0, %v235_v5  ;;  %v244_v13 = vadd.f32 %v242_v1, %v236_v6 }
  0x4d   :  { %v251_v19 = vadd.f32 %v249_v7, %v243_v12  ;;  %v252_v20 = vadd.f32 %v250_v8, %v244_v13 }
  0x4f   :  { %v259_v26 = vadd.f32 %v257_v14, %v251_v19  ;;  %v260_v27 = vadd.f32 %v258_v15, %v252_v20 }
  0x51   :  { %v267_v33 = vadd.f32 %v265_v21, %v259_v26  ;;  %v268_v34 = vadd.f32 %v266_v22, %v260_v27 }
  0x53   :  { %v275_v40 = vadd.f32 %v273_v28, %v267_v33  ;;  %v276_v41 = vadd.f32 %v274_v29, %v268_v34 }
  0x55   :  { %v283_v47 = vadd.f32 %v281_v35, %v275_v40  ;;  %v284_v48 = vadd.f32 %v282_v36, %v276_v41 }
  0x57   :  { %v291_v54 = vadd.f32 %v289_v42, %v283_v47  ;;  %v292_v55 = vadd.f32 %v290_v43, %v284_v48 }
  0x59   :  { %v299_v58 = vadd.f32 %v297_v49, %v291_v54  ;;  %v300_v59 = vadd.f32 %v298_v50, %v292_v55 }
  0x5b   :  { %v307_v62 = vadd.f32 %v305_v56, %v299_v58  ;;  %v308_v63 = vadd.f32 %v306_v57, %v300_v59 }
  0x5d   :  { %v315_v0 = vadd.f32 %v313_v60, %v307_v62  ;;  %v316_v1 = vadd.f32 %v314_v61, %v308_v63 }
  0x5f   :  { %v330_v2 = vrot.slane %v316_v1, 7 }
  0x61   :  { %v332_v3 = vsel %vm331_vm1, %v330_v2, %v315_v0 }
  0x62   :  { %488 = vmatmul.mubr.msk.f32.vlgmr.msra.gmra.mrb[0].mxu0 %vm333_vm2, %v332_v3 }
 0x135   :  { %v402_v5 = vpop.f32.mrb[0].mxu0 }
 0x136   :  { %v403_v6 = vadd.f32 %v472_v4, %v402_v5  ;;  %v489_v7 = vpop.f32.mrb[1].mxu0 }
 0x138   :  { %v406_v8 = vmul.f32 %v403_v6, %v403_v6 }
 0x13a   :  { %v408_v9 = vsel %vm407_vm3, %v406_v8, 0.0 }
 0x13b   :  { %409 = vadd.xlane.f32.xlu0 %v408_v9 }
 0x1c8   :  { %v410_v10 = vpop.xlane.xlu0 %409 }
 0x1c9   :  { %501 = vrsqrt.f32 %v410_v10  ;;  %vm413_vm4 = vcmp.eq.f32.partialorder %v410_v10, inf  ;;  %v416_v13 = vand.u32 2147483648, %v410_v10  ;;  %vm415_vm5 = vcmp.eq.f32.partialorder %v410_v10, 0.0 }
 0x1d3   :  { %v502_v11 = vpop.eup %501 }
 0x1d4   :  { %v412_v12 = vmul.f32 %v502_v11, %v410_v10 }
 0x1d6   :  { %v414_v14 = vsel %vm413_vm4, %v410_v10, %v412_v12 }
 0x1d7   :  { %v417_v15 = vsel %vm415_vm5, %v416_v13, %v414_v14 }
 0x1d8   :  { %v418_v16 = vadd.f32 1e-08, %v417_v15 }
 0x1da   :  { %503 = vrcp.f32 %v418_v16 }
 0x1e4   :  { %v504_v17 = vpop.eup %503 }
 0x1e5   :  { %v420_v18 = vmul.f32 %v504_v17, %v403_v6 }
 0x1e7   :  { %421 = vst [vmem:[#allocation5] sm:$0x3] %v420_v18 }
 0x1e8   :  { %528 = shalt.err (!%p525_p9)
}
 0x1e9   :  { %s529_s17 = scalar_lea.hbm %s919_s4, 32 }
 0x1ea   :  { %p530_p10 = scmp.ne.s32.totalorder %s919_s4, %s529_s17  ;;  %p533_p11 = scmp.lt.u32.totalorder %s529_s17, %s919_s4 }
 0x1ec   :  { %p535_p12 = pnand %p533_p11, %p530_p10 }
 0x1ee   :  { %538 = shalt.err (!%p535_p12)
}
 0x1ef   :  { %431 = dma.vmem_to_hbm [thread:$0]  %s429_s3, 32, %s919_s4, [#allocation3]  }
 0x1f0   :  { %541 = dma.done.wait [#allocation3], 32  }
 0x1f1   :  { %542 = vsyncadd [#allocation3], 4294967264 }
 0x1f2   :  { %435 = vsyncpa [#allocation3], 1 }
 0x1f3   :  { %436 = vsyncpa [#allocation4], 1 }

// kernel: tpu_custom_call.1
= control target key start
LH: loop header
LB: loop body
LE: loop exit
PB: predicated region body
PF: predicated region fallthrough
CT: control target
= control target key end

     0   :  { %9 = vsyncpa [#allocation4], 0  ;;  %s915_s0 = inlined_call_operand.vmem [shape: f32[36], index: 0, kind: input, shape index: {}]   ;;  %s916_s1 = inlined_call_operand.vmem [shape: f32[2,36,32], index: 1, kind: input, shape index: {}]   ;;  %s917_s2 = inlined_call_operand.vmem [shape: f32[32,128], index: 2, kind: input, shape index: {}]   ;;  %s918_s3 = inlined_call_operand.vmem [shape: f32[1,128], index: 3, kind: input, shape index: {}]   ;;  %s919_s4 = inlined_call_operand.hbm [shape: f32[2,128], index: 4, kind: output, shape index: {}]  }
   0x1   :  { %10 = vsyncpa [#allocation3], 0  ;;  %s17_s17 = sshll.u32 %s915_s0, 4  ;;  %s18_s17 = int_to_ptr.vmem [resolvable:$true] %s17_s17 }
   0x2   :  { %s505_s18 = scalar_lea.vmem %s18_s17, 16  ;;  %p510_p1 = scmp.lt.s32.totalorder %s18_s17, %s18_s17 }
   0x3   :  { %p506_p0 = scmp.ne.s32.totalorder %s18_s17, %s505_s18  ;;  %p511_p2 = scmp.lt.s32.totalorder %s505_s18, %s505_s18 }
   0x5   :  { %p512_p3 = por %p511_p2, %p510_p1 }
   0x7   :  { %p513_p4 = pnand %p512_p3, %p506_p0 }
   0x9   :  { %516 = shalt.err (!%p513_p4)
}
   0xa   :  { %s543_s19 = smov [#allocation2]  }
   0xb   :  { %20 = dma.vmem_to_smem %s18_s17, 16, %s543_s19, [#allocation4]  }
   0xc   :  { %539 = dma.done.wait [#allocation4], 16  }
   0xd   :  { %540 = vsyncadd [#allocation4], 4294967280 }
   0xe   :  { %30 = sfence }
   0xf   :  { %v317_v0 = vld [vmem:[%s917_s2] sm:$0xff]  ;;  %v318_v1 = vld [vmem:[%s917_s2 + $0x8] sm:$0xff]  ;;  %v319_v2 = vld [vmem:[%s917_s2 + $0x10] sm:$0xff]  ;;  %v544_v3 = vmov 0.0|0.0   ;;  %vm545_vm0 = vmmov 0   ;;  %v546_v6 = vmov 0.0  }
  0x10   :  { %490 = vmatprep.subr.bf16.mxu0 %v544_v3  ;;  %v491_v4 = vpack.c.bf16 %v318_v1, %v317_v0  ;;  %v320_v5 = vld [vmem:[%s917_s2 + $0x18] sm:$0xff]  ;;  %487 = vmatprep.mubr.msk.f32.mxu0 %vm545_vm0, %v546_v6  ;;  %s31_s27 = sld [smem:[#allocation2]]  ;;  %s437_s28 = sld [smem:[#allocation2 + $0x1]]  ;;  %v32_v8 = vld [vmem:[%s916_s1] sm:$0x1]  ;;  %vm331_vm1 = vcmask 1041409  }
  0x11   :  { %v494_v7 = vpack.c.bf16 %v320_v5, %v319_v2  ;;  %s438_s29 = sld [smem:[#allocation2 + $0x2]]  ;;  %s439_s30 = sld [smem:[#allocation2 + $0x3]]  ;;  %v33_v9 = vld [vmem:[%s916_s1 + $0x28] sm:$0x1]  ;;  %v38_v10 = vld [vmem:[%s916_s1 + $0x1] sm:$0x1] }
  0x12   :  { %492 = vmatpush3.bf16.msra.mxu0 %v491_v4  ;;  %s594_s9 = sld [smem:[#allocation2 + $0x4]]  ;;  %v39_v11 = vld [vmem:[%s916_s1 + $0x29] sm:$0x1]  ;;  %s602_s13 = sld [smem:[#allocation2 + $0x5]]  ;;  %v46_v13 = vld [vmem:[%s916_s1 + $0x2] sm:$0x1] }
  0x13   :  { %493 = vmatprep.subr.bf16.mxu0 %v544_v3  ;;  %v47_v14 = vld [vmem:[%s916_s1 + $0x2a] sm:$0x1]  ;;  %s610_s18 = sld [smem:[#allocation2 + $0x6]]  ;;  %v54_v18 = vld [vmem:[%s916_s1 + $0x3] sm:$0x1]  ;;  %s618_s23 = sld [smem:[#allocation2 + $0x7]] }
  0x14   :  { %v55_v19 = vld [vmem:[%s916_s1 + $0x2b] sm:$0x1]  ;;  %v62_v26 = vld [vmem:[%s916_s1 + $0x4] sm:$0x1]  ;;  %v63_v27 = vld [vmem:[%s916_s1 + $0x2c] sm:$0x1] }
  0x15   :  { %v70_v33 = vld [vmem:[%s916_s1 + $0x5] sm:$0x1]  ;;  %v71_v34 = vld [vmem:[%s916_s1 + $0x2d] sm:$0x1]  ;;  %s636_s6 = sld [smem:[#allocation2 + $0x9]]  ;;  %s645_s10 = sld [smem:[#allocation2 + $0xa]] }
  0x16   :  { %495 = vmatpush3.bf16.msra.mxu0 %v494_v7  ;;  %v34_v12 = vstv %s31_s27  ;;  %v40_v17 = vstv %s437_s28  ;;  %s626_s27 = sld [smem:[#allocation2 + $0x8]]  ;;  %v78_v40 = vld [vmem:[%s916_s1 + $0x6] sm:$0x1]  ;;  %v79_v41 = vld [vmem:[%s916_s1 + $0x2e] sm:$0x1]  ;;  %s654_s15 = sld [smem:[#allocation2 + $0xb]] }
  0x17   :  { %v35_v15 = vmul.f32 %v34_v12, %v32_v8  ;;  %v36_v16 = vmul.f32 %v34_v12, %v33_v9  ;;  %v41_v20 = vmul.f32 %v40_v17, %v38_v10  ;;  %v42_v21 = vmul.f32 %v40_v17, %v39_v11  ;;  %v86_v47 = vld [vmem:[%s916_s1 + $0x7] sm:$0x1]  ;;  %v87_v48 = vld [vmem:[%s916_s1 + $0x2f] sm:$0x1]  ;;  %v94_v54 = vld [vmem:[%s916_s1 + $0x8] sm:$0x1] }
  0x18   :  { %v48_v22 = vstv %s438_s29  ;;  %v56_v25 = vstv %s439_s30  ;;  %v64_v32 = vstv %s594_s9  ;;  %v72_v35 = vstv %s602_s13  ;;  %s663_s20 = sld [smem:[#allocation2 + $0xc]]  ;;  %s672_s24 = sld [smem:[#allocation2 + $0xd]] }
  0x19   :  { %v49_v23 = vmul.f32 %v48_v22, %v46_v13  ;;  %v50_v24 = vmul.f32 %v48_v22, %v47_v14  ;;  %v43_v28 = vadd.f32 %v41_v20, %v35_v15  ;;  %v44_v29 = vadd.f32 %v42_v21, %v36_v16  ;;  %v95_v55 = vld [vmem:[%s916_s1 + $0x30] sm:$0x1]  ;;  %v102_v61 = vld [vmem:[%s916_s1 + $0x9] sm:$0x1]  ;;  %v103_v62 = vld [vmem:[%s916_s1 + $0x31] sm:$0x1] }
  0x1a   :  { %v57_v30 = vmul.f32 %v56_v25, %v54_v18  ;;  %v58_v31 = vmul.f32 %v56_v25, %v55_v19  ;;  %v65_v38 = vmul.f32 %v64_v32, %v62_v26  ;;  %v66_v39 = vmul.f32 %v64_v32, %v63_v27  ;;  %v110_v4 = vld [vmem:[%s916_s1 + $0xa] sm:$0x1]  ;;  %v111_v5 = vld [vmem:[%s916_s1 + $0x32] sm:$0x1]  ;;  %s681_s29 = sld [smem:[#allocation2 + $0xe]]  ;;  %s690_s8 = sld [smem:[#allocation2 + $0xf]] }
  0x1b   :  { %v51_v36 = vadd.f32 %v49_v23, %v43_v28  ;;  %v52_v37 = vadd.f32 %v50_v24, %v44_v29  ;;  %v80_v42 = vstv %s610_s18  ;;  %v73_v45 = vmul.f32 %v72_v35, %v70_v33  ;;  %v118_v11 = vld [vmem:[%s916_s1 + $0xb] sm:$0x1]  ;;  %v119_v12 = vld [vmem:[%s916_s1 + $0x33] sm:$0x1]  ;;  %v126_v18 = vld [vmem:[%s916_s1 + $0xc] sm:$0x1] }
  0x1c   :  { %v74_v46 = vmul.f32 %v72_v35, %v71_v34  ;;  %v88_v49 = vstv %s618_s23  ;;  %v81_v52 = vmul.f32 %v80_v42, %v78_v40  ;;  %v82_v53 = vmul.f32 %v80_v42, %v79_v41  ;;  %v127_v19 = vld [vmem:[%s916_s1 + $0x34] sm:$0x1]  ;;  %s699_s12 = sld [smem:[#allocation2 + $0x10]]  ;;  %v134_v25 = vld [vmem:[%s916_s1 + $0xd] sm:$0x1]  ;;  %s708_s17 = sld [smem:[#allocation2 + $0x11]] }
  0x1d   :  { %v59_v43 = vadd.f32 %v57_v30, %v51_v36  ;;  %v60_v44 = vadd.f32 %v58_v31, %v52_v37  ;;  %v96_v56 = vstv %s626_s27  ;;  %v89_v59 = vmul.f32 %v88_v49, %v86_v47  ;;  %v135_v26 = vld [vmem:[%s916_s1 + $0x35] sm:$0x1]  ;;  %v142_v32 = vld [vmem:[%s916_s1 + $0xe] sm:$0x1]  ;;  %v143_v33 = vld [vmem:[%s916_s1 + $0x36] sm:$0x1] }
  0x1e   :  { %v90_v60 = vmul.f32 %v88_v49, %v87_v48  ;;  %v104_v63 = vstv %s636_s6  ;;  %v97_v2 = vmul.f32 %v96_v56, %v94_v54  ;;  %v98_v3 = vmul.f32 %v96_v56, %v95_v55  ;;  %s717_s22 = sld [smem:[#allocation2 + $0x12]]  ;;  %v151_v40 = vld [vmem:[%s916_s1 + $0x37] sm:$0x1]  ;;  %s726_s26 = sld [smem:[#allocation2 + $0x13]]  ;;  %v159_v47 = vld [vmem:[%s916_s1 + $0x38] sm:$0x1] }
  0x1f   :  { %v67_v50 = vadd.f32 %v65_v38, %v59_v43  ;;  %v68_v51 = vadd.f32 %v66_v39, %v60_v44  ;;  %v112_v6 = vstv %s645_s10  ;;  %v105_v9 = vmul.f32 %v104_v63, %v102_v61  ;;  %v150_v39 = vld [vmem:[%s916_s1 + $0xf] sm:$0x1]  ;;  %s735_s5 = sld [smem:[#allocation2 + $0x14]]  ;;  %v167_v54 = vld [vmem:[%s916_s1 + $0x39] sm:$0x1]  ;;  %s744_s2 = sld [smem:[#allocation2 + $0x15]] }
  0x20   :  { %v106_v10 = vmul.f32 %v104_v63, %v103_v62  ;;  %v120_v13 = vstv %s654_s15  ;;  %v113_v16 = vmul.f32 %v112_v6, %v110_v4  ;;  %v114_v17 = vmul.f32 %v112_v6, %v111_v5  ;;  %v175_v61 = vld [vmem:[%s916_s1 + $0x3a] sm:$0x1]  ;;  %s753_s14 = sld [smem:[#allocation2 + $0x16]]  ;;  %v183_v4 = vld [vmem:[%s916_s1 + $0x3b] sm:$0x1]  ;;  %s762_s19 = sld [smem:[#allocation2 + $0x17]] }
  0x21   :  { %v75_v57 = vadd.f32 %v73_v45, %v67_v50  ;;  %v76_v58 = vadd.f32 %v74_v46, %v68_v51  ;;  %v128_v20 = vstv %s663_s20  ;;  %v121_v23 = vmul.f32 %v120_v13, %v118_v11  ;;  %v158_v46 = vld [vmem:[%s916_s1 + $0x10] sm:$0x1]  ;;  %v191_v11 = vld [vmem:[%s916_s1 + $0x3c] sm:$0x1]  ;;  %s771_s0 = sld [smem:[#allocation2 + $0x18]]  ;;  %s780_s28 = sld [smem:[#allocation2 + $0x19]] }
  0x22   :  { %v122_v24 = vmul.f32 %v120_v13, %v119_v12  ;;  %v136_v27 = vstv %s672_s24  ;;  %v129_v30 = vmul.f32 %v128_v20, %v126_v18  ;;  %v130_v31 = vmul.f32 %v128_v20, %v127_v19  ;;  %v199_v18 = vld [vmem:[%s916_s1 + $0x3d] sm:$0x1]  ;;  %s789_s7 = sld [smem:[#allocation2 + $0x1a]]  ;;  %s798_s11 = sld [smem:[#allocation2 + $0x1b]] }
  0x23   :  { %v83_v0 = vadd.f32 %v81_v52, %v75_v57  ;;  %v84_v1 = vadd.f32 %v82_v53, %v76_v58  ;;  %v144_v34 = vstv %s681_s29  ;;  %v137_v37 = vmul.f32 %v136_v27, %v134_v25  ;;  %v166_v53 = vld [vmem:[%s916_s1 + $0x11] sm:$0x1]  ;;  %v207_v25 = vld [vmem:[%s916_s1 + $0x3e] sm:$0x1]  ;;  %s807_s16 = sld [smem:[#allocation2 + $0x1c]]  ;;  %s816_s21 = sld [smem:[#allocation2 + $0x1d]] }
  0x24   :  { %v138_v38 = vmul.f32 %v136_v27, %v135_v26  ;;  %v152_v41 = vstv %s690_s8  ;;  %v145_v44 = vmul.f32 %v144_v34, %v142_v32  ;;  %v146_v45 = vmul.f32 %v144_v34, %v143_v33  ;;  %v215_v32 = vld [vmem:[%s916_s1 + $0x3f] sm:$0x1]  ;;  %s825_s25 = sld [smem:[#allocation2 + $0x1e]]  ;;  %s834_s30 = sld [smem:[#allocation2 + $0x1f]] }
  0x25   :  { %v91_v7 = vadd.f32 %v89_v59, %v83_v0  ;;  %v92_v8 = vadd.f32 %v90_v60, %v84_v1  ;;  %v160_v48 = vstv %s699_s12  ;;  %v153_v51 = vmul.f32 %v152_v41, %v150_v39  ;;  %v174_v60 = vld [vmem:[%s916_s1 + $0x12] sm:$0x1]  ;;  %v223_v39 = vld [vmem:[%s916_s1 + $0x40] sm:$0x1]  ;;  %s843_s9 = sld [smem:[#allocation2 + $0x20]]  ;;  %s852_s13 = sld [smem:[#allocation2 + $0x21]] }
  0x26   :  { %v154_v52 = vmul.f32 %v152_v41, %v151_v40  ;;  %v168_v55 = vstv %s708_s17  ;;  %v161_v58 = vmul.f32 %v160_v48, %v158_v46  ;;  %v162_v59 = vmul.f32 %v160_v48, %v159_v47  ;;  %v231_v46 = vld [vmem:[%s916_s1 + $0x41] sm:$0x1]  ;;  %s861_s18 = sld [smem:[#allocation2 + $0x22]]  ;;  %s870_s23 = sld [smem:[#allocation2 + $0x23]] }
  0x27   :  { %v99_v14 = vadd.f32 %v97_v2, %v91_v7  ;;  %v100_v15 = vadd.f32 %v98_v3, %v92_v8  ;;  %v176_v62 = vstv %s717_s22  ;;  %v169_v1 = vmul.f32 %v168_v55, %v166_v53  ;;  %v182_v3 = vld [vmem:[%s916_s1 + $0x13] sm:$0x1]  ;;  %v239_v53 = vld [vmem:[%s916_s1 + $0x42] sm:$0x1] }
  0x28   :  { %v170_v2 = vmul.f32 %v168_v55, %v167_v54  ;;  %v184_v5 = vstv %s726_s26  ;;  %v177_v8 = vmul.f32 %v176_v62, %v174_v60  ;;  %v192_v12 = vstv %s735_s5  ;;  %v247_v60 = vld [vmem:[%s916_s1 + $0x43] sm:$0x1] }
  0x29   :  { %v107_v21 = vadd.f32 %v105_v9, %v99_v14  ;;  %v108_v22 = vadd.f32 %v106_v10, %v100_v15  ;;  %v178_v9 = vmul.f32 %v176_v62, %v175_v61  ;;  %v190_v10 = vld [vmem:[%s916_s1 + $0x14] sm:$0x1]  ;;  %v185_v15 = vmul.f32 %v184_v5, %v182_v3  ;;  %v255_v3 = vld [vmem:[%s916_s1 + $0x44] sm:$0x1] }
  0x2a   :  { %v200_v19 = vstv %s744_s2  ;;  %v208_v26 = vstv %s753_s14  ;;  %v216_v33 = vstv %s762_s19  ;;  %v224_v40 = vstv %s771_s0 }
  0x2b   :  { %v115_v28 = vadd.f32 %v113_v16, %v107_v21  ;;  %v116_v29 = vadd.f32 %v114_v17, %v108_v22  ;;  %v186_v16 = vmul.f32 %v184_v5, %v183_v4  ;;  %v198_v17 = vld [vmem:[%s916_s1 + $0x15] sm:$0x1]  ;;  %v193_v22 = vmul.f32 %v192_v12, %v190_v10  ;;  %v263_v10 = vld [vmem:[%s916_s1 + $0x45] sm:$0x1] }
  0x2c   :  { %v232_v47 = vstv %s780_s28  ;;  %v240_v54 = vstv %s789_s7  ;;  %v248_v61 = vstv %s798_s11  ;;  %v256_v4 = vstv %s807_s16 }
  0x2d   :  { %v123_v35 = vadd.f32 %v121_v23, %v115_v28  ;;  %v124_v36 = vadd.f32 %v122_v24, %v116_v29  ;;  %v194_v23 = vmul.f32 %v192_v12, %v191_v11  ;;  %v206_v24 = vld [vmem:[%s916_s1 + $0x16] sm:$0x1]  ;;  %v201_v29 = vmul.f32 %v200_v19, %v198_v17  ;;  %v271_v17 = vld [vmem:[%s916_s1 + $0x46] sm:$0x1] }
  0x2e   :  { %v264_v11 = vstv %s816_s21  ;;  %vm333_vm2 = vcmask 261120   ;;  %vm407_vm3 = vcmask 1041408  }
  0x2f   :  { %v131_v42 = vadd.f32 %v129_v30, %v123_v35  ;;  %v132_v43 = vadd.f32 %v130_v31, %v124_v36  ;;  %v202_v30 = vmul.f32 %v200_v19, %v199_v18  ;;  %v214_v31 = vld [vmem:[%s916_s1 + $0x17] sm:$0x1]  ;;  %v209_v36 = vmul.f32 %v208_v26, %v206_v24  ;;  %v279_v24 = vld [vmem:[%s916_s1 + $0x47] sm:$0x1] }
  0x30   :  { %v272_v18 = vstv %s825_s25 }
  0x31   :  { %v139_v49 = vadd.f32 %v137_v37, %v131_v42  ;;  %v140_v50 = vadd.f32 %v138_v38, %v132_v43  ;;  %v210_v37 = vmul.f32 %v208_v26, %v207_v25  ;;  %v222_v38 = vld [vmem:[%s916_s1 + $0x18] sm:$0x1]  ;;  %v217_v43 = vmul.f32 %v216_v33, %v214_v31  ;;  %v287_v31 = vld [vmem:[%s916_s1 + $0x48] sm:$0x1] }
  0x32   :  { %v280_v25 = vstv %s834_s30 }
  0x33   :  { %v147_v56 = vadd.f32 %v145_v44, %v139_v49  ;;  %v148_v57 = vadd.f32 %v146_v45, %v140_v50  ;;  %v218_v44 = vmul.f32 %v216_v33, %v215_v32  ;;  %v230_v45 = vld [vmem:[%s916_s1 + $0x19] sm:$0x1]  ;;  %v225_v50 = vmul.f32 %v224_v40, %v222_v38  ;;  %v295_v38 = vld [vmem:[%s916_s1 + $0x49] sm:$0x1] }
  0x34   :  { %v288_v32 = vstv %s843_s9 }
  0x35   :  { %v155_v63 = vadd.f32 %v153_v51, %v147_v56  ;;  %v156_v0 = vadd.f32 %v154_v52, %v148_v57  ;;  %v226_v51 = vmul.f32 %v224_v40, %v223_v39  ;;  %v238_v52 = vld [vmem:[%s916_s1 + $0x1a] sm:$0x1]  ;;  %v233_v57 = vmul.f32 %v232_v47, %v230_v45  ;;  %v303_v45 = vld [vmem:[%s916_s1 + $0x4a] sm:$0x1] }
  0x36   :  { %v296_v39 = vstv %s852_s13  ;;  %s547_s13 = smov [#allocation5]  }
  0x37   :  { %v163_v6 = vadd.f32 %v161_v58, %v155_v63  ;;  %v164_v7 = vadd.f32 %v162_v59, %v156_v0  ;;  %v234_v58 = vmul.f32 %v232_v47, %v231_v46  ;;  %v246_v59 = vld [vmem:[%s916_s1 + $0x1b] sm:$0x1]  ;;  %v241_v0 = vmul.f32 %v240_v54, %v238_v52  ;;  %v311_v52 = vld [vmem:[%s916_s1 + $0x4b] sm:$0x1] }
  0x38   :  { %v304_v46 = vstv %s861_s18 }
  0x39   :  { %v171_v13 = vadd.f32 %v169_v1, %v163_v6  ;;  %v172_v14 = vadd.f32 %v170_v2, %v164_v7  ;;  %v242_v1 = vmul.f32 %v240_v54, %v239_v53  ;;  %v254_v2 = vld [vmem:[%s916_s1 + $0x1c] sm:$0x1]  ;;  %v249_v7 = vmul.f32 %v248_v61, %v246_v59 }
  0x3a   :  { %v312_v53 = vstv %s870_s23 }
  0x3b   :  { %v179_v20 = vadd.f32 %v177_v8, %v171_v13  ;;  %v180_v21 = vadd.f32 %v178_v9, %v172_v14  ;;  %v250_v8 = vmul.f32 %v248_v61, %v247_v60  ;;  %v262_v9 = vld [vmem:[%s916_s1 + $0x1d] sm:$0x1]  ;;  %v257_v14 = vmul.f32 %v256_v4, %v254_v2 }
  0x3c   :  { %v314_v61 = vmul.f32 %v312_v53, %v311_v52 }
  0x3d   :  { %v187_v27 = vadd.f32 %v185_v15, %v179_v20  ;;  %v188_v28 = vadd.f32 %v186_v16, %v180_v21  ;;  %v258_v15 = vmul.f32 %v256_v4, %v255_v3  ;;  %v270_v16 = vld [vmem:[%s916_s1 + $0x1e] sm:$0x1]  ;;  %v265_v21 = vmul.f32 %v264_v11, %v262_v9  ;;  %v472_v4 = vld [vmem:[%s918_s3] ss:$0 sm:$0xff]  ;;  %s428_s3 = sshll.u32 %s547_s13, 4  ;;  %s429_s3 = int_to_ptr.vmem [resolvable:$true] %s428_s3 }
  0x3e   :  { %s517_s14 = scalar_lea.vmem %s429_s3, 32  ;;  %p522_p6 = scmp.lt.s32.totalorder %s429_s3, %s429_s3 }
  0x3f   :  { %v195_v34 = vadd.f32 %v193_v22, %v187_v27  ;;  %v196_v35 = vadd.f32 %v194_v23, %v188_v28  ;;  %v266_v22 = vmul.f32 %v264_v11, %v263_v10  ;;  %v278_v23 = vld [vmem:[%s916_s1 + $0x1f] sm:$0x1]  ;;  %v273_v28 = vmul.f32 %v272_v18, %v270_v16  ;;  %p518_p5 = scmp.ne.s32.totalorder %s429_s3, %s517_s14  ;;  %p523_p7 = scmp.lt.s32.totalorder %s517_s14, %s517_s14 }
  0x41   :  { %v203_v41 = vadd.f32 %v201_v29, %v195_v34  ;;  %v204_v42 = vadd.f32 %v202_v30, %v196_v35  ;;  %v274_v29 = vmul.f32 %v272_v18, %v271_v17  ;;  %v286_v30 = vld [vmem:[%s916_s1 + $0x20] sm:$0x1]  ;;  %v281_v35 = vmul.f32 %v280_v25, %v278_v23  ;;  %p524_p8 = por %p523_p7, %p522_p6 }
  0x43   :  { %v211_v48 = vadd.f32 %v209_v36, %v203_v41  ;;  %v212_v49 = vadd.f32 %v210_v37, %v204_v42  ;;  %v282_v36 = vmul.f32 %v280_v25, %v279_v24  ;;  %v294_v37 = vld [vmem:[%s916_s1 + $0x21] sm:$0x1]  ;;  %v289_v42 = vmul.f32 %v288_v32, %v286_v30  ;;  %p525_p9 = pnand %p524_p8, %p518_p5 }
  0x45   :  { %v219_v55 = vadd.f32 %v217_v43, %v211_v48  ;;  %v220_v56 = vadd.f32 %v218_v44, %v212_v49  ;;  %v290_v43 = vmul.f32 %v288_v32, %v287_v31  ;;  %v302_v44 = vld [vmem:[%s916_s1 + $0x22] sm:$0x1]  ;;  %v297_v49 = vmul.f32 %v296_v39, %v294_v37 }
  0x47   :  { %v227_v62 = vadd.f32 %v225_v50, %v219_v55  ;;  %v228_v63 = vadd.f32 %v226_v51, %v220_v56  ;;  %v298_v50 = vmul.f32 %v296_v39, %v295_v38  ;;  %v310_v51 = vld [vmem:[%s916_s1 + $0x23] sm:$0x1]  ;;  %v305_v56 = vmul.f32 %v304_v46, %v302_v44 }
  0x48   :  { %v313_v60 = vmul.f32 %v312_v53, %v310_v51 }
  0x49   :  { %v235_v5 = vadd.f32 %v233_v57, %v227_v62  ;;  %v236_v6 = vadd.f32 %v234_v58, %v228_v63  ;;  %v306_v57 = vmul.f32 %v304_v46, %v303_v45 }
  0x4b   :  { %v243_v12 = vadd.f32 %v241_v0, %v235_v5  ;;  %v244_v13 = vadd.f32 %v242_v1, %v236_v6 }
  0x4d   :  { %v251_v19 = vadd.f32 %v249_v7, %v243_v12  ;;  %v252_v20 = vadd.f32 %v250_v8, %v244_v13 }
  0x4f   :  { %v259_v26 = vadd.f32 %v257_v14, %v251_v19  ;;  %v260_v27 = vadd.f32 %v258_v15, %v252_v20 }
  0x51   :  { %v267_v33 = vadd.f32 %v265_v21, %v259_v26  ;;  %v268_v34 = vadd.f32 %v266_v22, %v260_v27 }
  0x53   :  { %v275_v40 = vadd.f32 %v273_v28, %v267_v33  ;;  %v276_v41 = vadd.f32 %v274_v29, %v268_v34 }
  0x55   :  { %v283_v47 = vadd.f32 %v281_v35, %v275_v40  ;;  %v284_v48 = vadd.f32 %v282_v36, %v276_v41 }
  0x57   :  { %v291_v54 = vadd.f32 %v289_v42, %v283_v47  ;;  %v292_v55 = vadd.f32 %v290_v43, %v284_v48 }
  0x59   :  { %v299_v58 = vadd.f32 %v297_v49, %v291_v54  ;;  %v300_v59 = vadd.f32 %v298_v50, %v292_v55 }
  0x5b   :  { %v307_v62 = vadd.f32 %v305_v56, %v299_v58  ;;  %v308_v63 = vadd.f32 %v306_v57, %v300_v59 }
  0x5d   :  { %v315_v0 = vadd.f32 %v313_v60, %v307_v62  ;;  %v316_v1 = vadd.f32 %v314_v61, %v308_v63 }
  0x5f   :  { %v330_v2 = vrot.slane %v316_v1, 7 }
  0x61   :  { %v332_v3 = vsel %vm331_vm1, %v330_v2, %v315_v0 }
  0x62   :  { %488 = vmatmul.mubr.msk.f32.vlgmr.msra.gmra.mrb[0].mxu0 %vm333_vm2, %v332_v3 }
 0x135   :  { %v402_v5 = vpop.f32.mrb[0].mxu0 }
 0x136   :  { %v403_v6 = vadd.f32 %v472_v4, %v402_v5  ;;  %v489_v7 = vpop.f32.mrb[1].mxu0 }
 0x138   :  { %v406_v8 = vmul.f32 %v403_v6, %v403_v6 }
 0x13a   :  { %v408_v9 = vsel %vm407_vm3, %v406_v8, 0.0 }
 0x13b   :  { %409 = vadd.xlane.f32.xlu0 %v408_v9 }
 0x1c8   :  { %v410_v10 = vpop.xlane.xlu0 %409 }
 0x1c9   :  { %501 = vrsqrt.f32 %v410_v10  ;;  %vm413_vm4 = vcmp.eq.f32.partialorder %v410_v10, inf  ;;  %v416_v13 = vand.u32 2147483648, %v410_v10  ;;  %vm415_vm5 = vcmp.eq.f32.partialorder %v410_v10, 0.0 }
 0x1d3   :  { %v502_v11 = vpop.eup %501 }
 0x1d4   :  { %v412_v12 = vmul.f32 %v502_v11, %v410_v10 }
 0x1d6   :  { %v414_v14 = vsel %vm413_vm4, %v410_v10, %v412_v12 }
 0x1d7   :  { %v417_v15 = vsel %vm415_vm5, %v416_v13, %v414_v14 }
 0x1d8   :  { %v418_v16 = vadd.f32 1e-08, %v417_v15 }
 0x1da   :  { %503 = vrcp.f32 %v418_v16 }
 0x1e4   :  { %v504_v17 = vpop.eup %503 }
 0x1e5   :  { %v420_v18 = vmul.f32 %v504_v17, %v403_v6 }
 0x1e7   :  { %421 = vst [vmem:[#allocation5] sm:$0x3] %v420_v18 }
 0x1e8   :  { %528 = shalt.err (!%p525_p9)
}
 0x1e9   :  { %s529_s17 = scalar_lea.hbm %s919_s4, 32 }
 0x1ea   :  { %p530_p10 = scmp.ne.s32.totalorder %s919_s4, %s529_s17  ;;  %p533_p11 = scmp.lt.u32.totalorder %s529_s17, %s919_s4 }
 0x1ec   :  { %p535_p12 = pnand %p533_p11, %p530_p10 }
 0x1ee   :  { %538 = shalt.err (!%p535_p12)
}
 0x1ef   :  { %431 = dma.vmem_to_hbm [thread:$0]  %s429_s3, 32, %s919_s4, [#allocation3]  }
 0x1f0   :  { %541 = dma.done.wait [#allocation3], 32  }
 0x1f1   :  { %542 = vsyncadd [#allocation3], 4294967264 }
 0x1f2   :  { %435 = vsyncpa [#allocation3], 1 }
 0x1f3   :  { %436 = vsyncpa [#allocation4], 1 }

</bundles_post_ra>
